<compile_context>
chip_gen: v5e
topology: v5e:2x2
jax: 0.10.0
libtpu: 0.0.40
codegen_flags: <defaults>
</compile_context>

<pallas_src>
import math
import jax
import jax.numpy as jnp
from jax.experimental import pallas as pl
from jax.experimental.pallas import tpu as pltpu


def _round_up(x, m):
    return ((x + m - 1) // m) * m


def _vmem_limit_bytes():
    """~3/4 of physical VMEM (96 MiB v5e/v6e, 48 MiB v7x); safe fallback."""
    try:
        cap = int(pltpu.get_tpu_info().vmem_capacity_bytes)
    except Exception:
        cap = 64 * 1024 * 1024
    return max(cap * 3 // 4, 32 * 1024 * 1024)


# ----------------------------- Pallas kernel --------------------------------

def gru_sage_fused_kernel(a_hbm_ref, x_ref, h_ref, w_all_ref, whh_ref, b_ref,
                          out_ref, a_vmem, xh_ref):
    """One grid step == one GRU-SAGE layer.

    Per layer (A = row-normalized adjacency with self-loops, so mean-pool
    SAGEConv with identity act is A @ (inp W + b) == A @ (inp W) + b):
        u    = [x | h] @ [[Wxz|Wxr|Wxh],[Whz|Whr|0]]               (N, 3H)
        agg  = A @ u + [ bxz+bhz | bxr+bhr | bxh+bhh ]
        z    = sigmoid(agg[:, 0:H]);   r = sigmoid(agg[:, H:2H])
        ht   = tanh(agg[:, 2H:3H] + A @ ((r*h) Whh))
        h'   = z*h + (1-z)*ht
    Padded node rows accumulate bias garbage in the carry, but A's padded
    columns are zero so it never leaks into real rows; padded hidden columns
    stay exactly zero.
    """
    i = pl.program_id(0)
    Hp = whh_ref.shape[2]

    @pl.when(i == 0)
    def _():
        # One-time: bring A into VMEM (single copy, no double buffering) and
        # seed the carry with the (padded, bf16) external input features.
        pltpu.sync_copy(a_hbm_ref, a_vmem)
        xh_ref[:, :Hp] = x_ref[...]

    h = h_ref[0]                                      # (Np, Hp) f32, this layer's state
    xh_ref[:, Hp:] = h.astype(jnp.bfloat16)           # [carry | h] operand for the MXU

    A = a_vmem[...]                                   # (Np, Np) bf16, resident

    # fused pre-aggregation linear terms, K = 2*Hp (fills the 256-deep MXU)
    u_bf = jnp.dot(xh_ref[...], w_all_ref[0],
                   preferred_element_type=jnp.float32).astype(jnp.bfloat16)  # (Np, 3Hp)

    # single wide neighborhood aggregation for z, r and the x-side of h_tilde
    agg = jnp.dot(A, u_bf, preferred_element_type=jnp.float32) + b_ref[0]    # (Np, 3Hp) f32

    z = jax.nn.sigmoid(agg[:, :Hp])
    r = jax.nn.sigmoid(agg[:, Hp:2 * Hp])

    rh_bf = (r * h).astype(jnp.bfloat16)
    uhh_bf = jnp.dot(rh_bf, whh_ref[0],
                     preferred_element_type=jnp.float32).astype(jnp.bfloat16)  # (Np, Hp)
    agg_hh = jnp.dot(A, uhh_bf, preferred_element_type=jnp.float32)
    h_tilde = jnp.tanh(agg[:, 2 * Hp:] + agg_hh)

    h_new = z * h + (1.0 - z) * h_tilde               # f32, lane-dense (Hp multiple of 128)
    out_ref[0] = h_new
    xh_ref[:, :Hp] = h_new.astype(jnp.bfloat16)       # bf16 carry feeds the next layer


# ------------------------------ glue (JAX) -----------------------------------

def build_norm_adj(edge_index, num_nodes):
    """remove_self_loops -> add_self_loops -> row-normalized dense adjacency.

    With this A, scatter_mean(y[col], row, dim_size=N) == A @ y.
    (Runs eagerly; boolean-mask filtering is fine outside jit.)
    """
    row, col = edge_index[0], edge_index[1]
    keep = row != col
    row, col = row[keep], col[keep]
    sl = jnp.arange(num_nodes, dtype=row.dtype)
    row = jnp.concatenate([row, sl])
    col = jnp.concatenate([col, sl])
    A = jnp.zeros((num_nodes, num_nodes), jnp.float32).at[row, col].add(1.0)
    deg = jnp.zeros((num_nodes,), jnp.float32).at[row].add(1.0)
    return A / deg[:, None]


def init_params(key, input_size, hidden_size, n_layer):
    """Deterministic init matching SAGEConv.reset_parameters:
       uniform(-1/sqrt(in_channels), 1/sqrt(in_channels)) for weight & bias."""
    params = []
    names = ["xz", "hz", "xr", "hr", "xh", "hh"]
    for layer in range(n_layer):
        lp = {}
        for name in names:
            in_ch = input_size if (layer == 0 and name.startswith("x")) else hidden_size
            stdv = 1.0 / math.sqrt(in_ch)
            key, kw, kb = jax.random.split(key, 3)
            lp["w" + name] = jax.random.uniform(
                kw, (in_ch, hidden_size), jnp.float32, minval=-stdv, maxval=stdv)
            lp["b" + name] = jax.random.uniform(
                kb, (1, hidden_size), jnp.float32, minval=-stdv, maxval=stdv)
        params.append(lp)
    return params


def pack_params(params, Hp):
    """Pack per-layer gate weights/biases into padded, concatenated bf16 tensors.

    W_all = [[Wxz|Wxr|Wxh],
             [Whz|Whr| 0 ]]   (2Hp, 3Hp)  so that  [x|h] @ W_all gives all
    pre-aggregation gate terms in one K=2Hp matmul.
    """
    zero = jnp.zeros((Hp, Hp), jnp.float32)
    W_all_l, Whh_l, B_l = [], [], []
    for lp in params:
        def pad_w(w):
            return jnp.zeros((Hp, Hp), jnp.float32).at[:w.shape[0], :w.shape[1]].set(w)

        def pad_b(b):
            return jnp.zeros((1, Hp), jnp.float32).at[:, :b.shape[1]].set(b)

        top = jnp.concatenate([pad_w(lp["wxz"]), pad_w(lp["wxr"]), pad_w(lp["wxh"])], axis=1)
        bot = jnp.concatenate([pad_w(lp["whz"]), pad_w(lp["whr"]), zero], axis=1)
        W_all_l.append(jnp.concatenate([top, bot], axis=0))          # (2Hp, 3Hp)
        Whh_l.append(pad_w(lp["whh"]))                               # (Hp, Hp)
        B_l.append(jnp.concatenate(
            [pad_b(lp["bxz"]) + pad_b(lp["bhz"]),
             pad_b(lp["bxr"]) + pad_b(lp["bhr"]),
             pad_b(lp["bxh"]) + pad_b(lp["bhh"])], axis=1))          # (1, 3Hp)
    W_all = jnp.stack(W_all_l).astype(jnp.bfloat16)   # (L, 2Hp, 3Hp)
    Whh = jnp.stack(Whh_l).astype(jnp.bfloat16)       # (L, Hp, Hp)
    B = jnp.stack(B_l)                                # (L, 1, 3Hp) f32
    return W_all, Whh, B


def graph_gru_sage_forward(inp, edge_index, h0, params):
    """Mirror of graph_gru_sage.forward: returns (out, h_out), each (L, N, H)."""
    L, N, H = h0.shape
    F = inp.shape[1]
    # Lane-dense padding everywhere; for very large N on v6e/v7x a 256-multiple
    # would match the 2x256^2 MXU depth even better.
    Np = _round_up(N, 128)
    Hp = _round_up(max(H, F), 128)

    A = build_norm_adj(edge_index, N)
    A_p = jnp.zeros((Np, Np), jnp.float32).at[:N, :N].set(A).astype(jnp.bfloat16)
    x_p = jnp.zeros((Np, Hp), jnp.float32).at[:N, :F].set(inp).astype(jnp.bfloat16)
    h_p = jnp.zeros((L, Np, Hp), jnp.float32).at[:, :N, :H].set(h0)

    W_all, Whh, B = pack_params(params, Hp)

    out_p = pl.pallas_call(
        gru_sage_fused_kernel,
        out_shape=jax.ShapeDtypeStruct((L, Np, Hp), jnp.float32),
        grid_spec=pltpu.PrefetchScalarGridSpec(
            num_scalar_prefetch=0,
            grid=(L,),
            in_specs=[
                pl.BlockSpec(memory_space=pl.ANY),                       # A: stays in HBM, copied once
                pl.BlockSpec((Np, Hp), lambda i: (0, 0)),                # layer-0 input features (bf16)
                pl.BlockSpec((1, Np, Hp), lambda i: (i, 0, 0)),          # h[i] (f32)
                pl.BlockSpec((1, 2 * Hp, 3 * Hp), lambda i: (i, 0, 0)),  # [[Wxz|Wxr|Wxh],[Whz|Whr|0]]
                pl.BlockSpec((1, Hp, Hp), lambda i: (i, 0, 0)),          # Whh
                pl.BlockSpec((1, 1, 3 * Hp), lambda i: (i, 0, 0)),       # combined biases
            ],
            out_specs=pl.BlockSpec((1, Np, Hp), lambda i: (i, 0, 0)),
            scratch_shapes=[
                pltpu.VMEM((Np, Np), jnp.bfloat16),       # resident A (single copy)
                pltpu.VMEM((Np, 2 * Hp), jnp.bfloat16),   # [carry | h] fused-matmul operand
            ],
        ),
        compiler_params=pltpu.CompilerParams(
            # layers are sequentially dependent via the carry scratch
            dimension_semantics=("arbitrary",),
            vmem_limit_bytes=_vmem_limit_bytes(),
        ),
    )(A_p, x_p, h_p, W_all, Whh, B)

    out = out_p[:, :N, :H]
    return out, out


# ----------------------- pure-JAX reference (sanity) --------------------------

def reference_forward(inp, edge_index, h, params):
    A = build_norm_adj(edge_index, inp.shape[0])

    def sage(x, w, b):
        return A @ (x @ w + b)

    outs = []
    x_cur = inp
    for i in range(h.shape[0]):
        p = params[i]
        hi = h[i]
        z = jax.nn.sigmoid(sage(x_cur, p["wxz"], p["bxz"]) + sage(hi, p["whz"], p["bhz"]))
        r = jax.nn.sigmoid(sage(x_cur, p["wxr"], p["bxr"]) + sage(hi, p["whr"], p["bhr"]))
        ht = jnp.tanh(sage(x_cur, p["wxh"], p["bxh"]) + sage(r * hi, p["whh"], p["bhh"]))
        ho = z * hi + (1.0 - z) * ht
        outs.append(ho)
        x_cur = ho
    out = jnp.stack(outs, 0)
    return out, out


# --------------------------------- main --------------------------------------

if __name__ == "__main__":
    N = 16           # number of graph nodes
    INPUT_SIZE = 8   # input feature dim
    HIDDEN = 32      # hidden dim
    N_LAYER = 2
    N_EDGES = 40

    key = jax.random.PRNGKey(0)
    k_x, k_h, k_er, k_ec, k_p = jax.random.split(key, 5)

    inp = jax.random.normal(k_x, (N, INPUT_SIZE), jnp.float32)
    h0 = jax.random.normal(k_h, (N_LAYER, N, HIDDEN), jnp.float32)
    edge_row = jax.random.randint(k_er, (N_EDGES,), 0, N, jnp.int32)
    edge_col = jax.random.randint(k_ec, (N_EDGES,), 0, N, jnp.int32)
    edge_index = jnp.stack([edge_row, edge_col], axis=0)  # (2, E)

    params = init_params(k_p, INPUT_SIZE, HIDDEN, N_LAYER)

    out, h_out = graph_gru_sage_forward(inp, edge_index, h0, params)
    out = jax.block_until_ready(out)
    h_out = jax.block_until_ready(h_out)

    # sanity check against a pure-f32 JAX reference (kernel runs matmuls in
    # bf16 with f32 accumulation, so the tolerance is correspondingly loose)
    ref_out, _ = reference_forward(inp, edge_index, h0, params)
    assert out.shape == (N_LAYER, N, HIDDEN)
    err = float(jnp.max(jnp.abs(out - ref_out)))
    assert jnp.allclose(out, ref_out, atol=1e-1, rtol=1e-1), err

    print("KERNEL_OK")
</pallas_src>

<mosaic_0001>
module attributes {stable_mosaic.version = 11 : i64} {
  func.func @gru_sage_fused_kernel(%arg0: i32, %arg1: memref<128x128xbf16, #tpu.memory_space<any>>, %arg2: memref<128x128xbf16, #tpu.memory_space<vmem>>, %arg3: memref<1x128x128xf32, #tpu.memory_space<vmem>>, %arg4: memref<1x256x384xbf16, #tpu.memory_space<vmem>>, %arg5: memref<1x128x128xbf16, #tpu.memory_space<vmem>>, %arg6: memref<1x1x384xf32, #tpu.memory_space<vmem>>, %arg7: memref<1x128x128xf32, #tpu.memory_space<vmem>>, %arg8: memref<128x128xbf16, #tpu.memory_space<vmem>>, %arg9: memref<128x256xbf16, #tpu.memory_space<vmem>>) attributes {dimension_semantics = [#tpu.dimension_semantics<arbitrary>], iteration_bounds = array<i64: 2>, scalar_prefetch = 0 : i64, scratch_operands = 2 : i64, tpu.core_type = #tpu.core_type<tc>, window_params = [{}, {pipeline_mode = #tpu.pipeline_mode<synchronous>, transform_indices = @transform_1, window_bounds = array<i64: 128, 128>}, {transform_indices = @transform_2, window_bounds = array<i64: 1, 128, 128>}, {transform_indices = @transform_3, window_bounds = array<i64: 1, 256, 384>}, {transform_indices = @transform_4, window_bounds = array<i64: 1, 128, 128>}, {transform_indices = @transform_5, window_bounds = array<i64: 1, 1, 384>}, {transform_indices = @transform_6, window_bounds = array<i64: 1, 128, 128>}]} {
    %c0_i32 = arith.constant 0 : i32
    %0 = arith.cmpi eq, %arg0, %c0_i32 : i32
    %1 = arith.extui %0 : i1 to i32
    %c0_i32_0 = arith.constant 0 : i32
    %2 = arith.cmpi ne, %1, %c0_i32_0 : i32
    scf.if %2 {
      "tpu.region"() ({
        %52 = tpu.sem_alloc : memref<!tpu.dma_semaphore, #tpu.memory_space<semaphore_mem>>
        tpu.enqueue_dma source(%arg1 : memref<128x128xbf16, #tpu.memory_space<any>>) target(%arg8 : memref<128x128xbf16, #tpu.memory_space<vmem>>) target_semaphore(%52 : memref<!tpu.dma_semaphore, #tpu.memory_space<semaphore_mem>>)
        tpu.wait_dma2 semaphore(%52 : memref<!tpu.dma_semaphore, #tpu.memory_space<semaphore_mem>>) src(%arg1 : memref<128x128xbf16, #tpu.memory_space<any>>) dst(%arg8 : memref<128x128xbf16, #tpu.memory_space<vmem>>)
        tpu.yield
      }) : () -> ()
      %c0_28 = arith.constant 0 : index
      %c0_29 = arith.constant 0 : index
      %50 = vector.load %arg2[%c0_28, %c0_29] : memref<128x128xbf16, #tpu.memory_space<vmem>>, vector<128x128xbf16>
      %c0_30 = arith.constant 0 : index
      %c0_31 = arith.constant 0 : index
      %51 = vector.load %arg9[%c0_30, %c0_31] : memref<128x256xbf16, #tpu.memory_space<vmem>>, vector<128x128xbf16>
      tpu.vector_store %arg9[%c0_30, %c0_31], %50 {strides = array<i32>} : memref<128x256xbf16, #tpu.memory_space<vmem>>, vector<128x128xbf16>,
    } else {
    }
    %c0 = arith.constant 0 : index
    %c0_1 = arith.constant 0 : index
    %c0_2 = arith.constant 0 : index
    %3 = vector.load %arg3[%c0, %c0_1, %c0_2] : memref<1x128x128xf32, #tpu.memory_space<vmem>>, vector<1x128x128xf32>
    %4 = vector.shape_cast %3 : vector<1x128x128xf32> to vector<128x128xf32>
    %5 = arith.truncf %4 : vector<128x128xf32> to vector<128x128xbf16>
    %c0_3 = arith.constant 0 : index
    %c128 = arith.constant 128 : index
    %6 = vector.load %arg9[%c0_3, %c128] : memref<128x256xbf16, #tpu.memory_space<vmem>>, vector<128x128xbf16>
    tpu.vector_store %arg9[%c0_3, %c128], %5 {strides = array<i32>} : memref<128x256xbf16, #tpu.memory_space<vmem>>, vector<128x128xbf16>,
    %c0_4 = arith.constant 0 : index
    %c0_5 = arith.constant 0 : index
    %7 = vector.load %arg8[%c0_4, %c0_5] : memref<128x128xbf16, #tpu.memory_space<vmem>>, vector<128x128xbf16>
    %c0_6 = arith.constant 0 : index
    %c0_7 = arith.constant 0 : index
    %8 = vector.load %arg9[%c0_6, %c0_7] : memref<128x256xbf16, #tpu.memory_space<vmem>>, vector<128x256xbf16>
    %c0_8 = arith.constant 0 : index
    %c0_9 = arith.constant 0 : index
    %c0_10 = arith.constant 0 : index
    %9 = vector.load %arg4[%c0_8, %c0_9, %c0_10] : memref<1x256x384xbf16, #tpu.memory_space<vmem>>, vector<1x256x384xbf16>
    %10 = vector.shape_cast %9 : vector<1x256x384xbf16> to vector<256x384xbf16>
    %cst = arith.constant dense<0.000000e+00> : vector<128x384xf32>
    %11 = tpu.matmul %8, %10, %cst {dimension_numbers = #tpu.dot_dimension_numbers<[1], [0], [0], [1], [0, 0, 1, 1], [], []>} : vector<128x256xbf16>, vector<256x384xbf16>, vector<128x384xf32> -> vector<128x384xf32>
    %12 = arith.truncf %11 : vector<128x384xf32> to vector<128x384xbf16>
    %cst_11 = arith.constant dense<0.000000e+00> : vector<128x384xf32>
    %13 = tpu.matmul %7, %12, %cst_11 {dimension_numbers = #tpu.dot_dimension_numbers<[1], [0], [0], [1], [0, 0, 1, 1], [], []>} : vector<128x128xbf16>, vector<128x384xbf16>, vector<128x384xf32> -> vector<128x384xf32>
    %c0_12 = arith.constant 0 : index
    %c0_13 = arith.constant 0 : index
    %c0_14 = arith.constant 0 : index
    %14 = vector.load %arg6[%c0_12, %c0_13, %c0_14] : memref<1x1x384xf32, #tpu.memory_space<vmem>>, vector<1x1x384xf32>
    %15 = vector.shape_cast %14 : vector<1x1x384xf32> to vector<1x384xf32>
    %16 = vector.broadcast %15 : vector<1x384xf32> to vector<128x384xf32>
    %17 = arith.addf %13, %16 : vector<128x384xf32>
    %18 = vector.extract_strided_slice %17 {offsets = [0, 0], sizes = [128, 128], strides = [1, 1]} : vector<128x384xf32> to vector<128x128xf32>
    %19 = arith.negf %18 : vector<128x128xf32>
    %20 = math.exp %19 : vector<128x128xf32>
    %cst_15 = arith.constant 1.000000e+00 : f32
    %21 = vector.broadcast %cst_15 : f32 to vector<128x128xf32>
    %22 = arith.addf %21, %20 : vector<128x128xf32>
    %23 = arith.divf %21, %22 : vector<128x128xf32>
    %24 = vector.extract_strided_slice %17 {offsets = [0, 128], sizes = [128, 128], strides = [1, 1]} : vector<128x384xf32> to vector<128x128xf32>
    %25 = arith.negf %24 : vector<128x128xf32>
    %26 = math.exp %25 : vector<128x128xf32>
    %cst_16 = arith.constant 1.000000e+00 : f32
    %27 = vector.broadcast %cst_16 : f32 to vector<128x128xf32>
    %28 = arith.addf %27, %26 : vector<128x128xf32>
    %29 = arith.divf %27, %28 : vector<128x128xf32>
    %30 = arith.mulf %29, %4 : vector<128x128xf32>
    %31 = arith.truncf %30 : vector<128x128xf32> to vector<128x128xbf16>
    %c0_17 = arith.constant 0 : index
    %c0_18 = arith.constant 0 : index
    %c0_19 = arith.constant 0 : index
    %32 = vector.load %arg5[%c0_17, %c0_18, %c0_19] : memref<1x128x128xbf16, #tpu.memory_space<vmem>>, vector<1x128x128xbf16>
    %33 = vector.shape_cast %32 : vector<1x128x128xbf16> to vector<128x128xbf16>
    %cst_20 = arith.constant dense<0.000000e+00> : vector<128x128xf32>
    %34 = tpu.matmul %31, %33, %cst_20 {dimension_numbers = #tpu.dot_dimension_numbers<[1], [0], [0], [1], [0, 0, 1, 1], [], []>} : vector<128x128xbf16>, vector<128x128xbf16>, vector<128x128xf32> -> vector<128x128xf32>
    %35 = arith.truncf %34 : vector<128x128xf32> to vector<128x128xbf16>
    %cst_21 = arith.constant dense<0.000000e+00> : vector<128x128xf32>
    %36 = tpu.matmul %7, %35, %cst_21 {dimension_numbers = #tpu.dot_dimension_numbers<[1], [0], [0], [1], [0, 0, 1, 1], [], []>} : vector<128x128xbf16>, vector<128x128xbf16>, vector<128x128xf32> -> vector<128x128xf32>
    %37 = vector.extract_strided_slice %17 {offsets = [0, 256], sizes = [128, 128], strides = [1, 1]} : vector<128x384xf32> to vector<128x128xf32>
    %38 = arith.addf %37, %36 : vector<128x128xf32>
    %39 = math.tanh %38 : vector<128x128xf32>
    %40 = arith.mulf %23, %4 : vector<128x128xf32>
    %cst_22 = arith.constant 1.000000e+00 : f32
    %41 = vector.broadcast %cst_22 : f32 to vector<128x128xf32>
    %42 = arith.subf %41, %23 : vector<128x128xf32>
    %43 = arith.mulf %42, %39 : vector<128x128xf32>
    %44 = arith.addf %40, %43 : vector<128x128xf32>
    %c0_23 = arith.constant 0 : index
    %c0_24 = arith.constant 0 : index
    %c0_25 = arith.constant 0 : index
    %45 = vector.load %arg7[%c0_23, %c0_24, %c0_25] : memref<1x128x128xf32, #tpu.memory_space<vmem>>, vector<1x128x128xf32>
    %46 = vector.shape_cast %45 : vector<1x128x128xf32> to vector<128x128xf32>
    %47 = vector.shape_cast %44 : vector<128x128xf32> to vector<1x128x128xf32>
    tpu.vector_store %arg7[%c0_23, %c0_24, %c0_25], %47 {strides = array<i32>} : memref<1x128x128xf32, #tpu.memory_space<vmem>>, vector<1x128x128xf32>,
    %48 = arith.truncf %44 : vector<128x128xf32> to vector<128x128xbf16>
    %c0_26 = arith.constant 0 : index
    %c0_27 = arith.constant 0 : index
    %49 = vector.load %arg9[%c0_26, %c0_27] : memref<128x256xbf16, #tpu.memory_space<vmem>>, vector<128x128xbf16>
    tpu.vector_store %arg9[%c0_26, %c0_27], %48 {strides = array<i32>} : memref<128x256xbf16, #tpu.memory_space<vmem>>, vector<128x128xbf16>,
    return
  }
  func.func @transform_1(%arg0: i32) -> (i32, i32) {
    %c0_i32 = arith.constant 0 : i32
    %c0_i32_0 = arith.constant 0 : i32
    %c0_i32_1 = arith.constant 0 : i32
    return %c0_i32, %c0_i32_0 : i32, i32
  }
  func.func @transform_2(%arg0: i32) -> (i32, i32, i32) {
    %c0_i32 = arith.constant 0 : i32
    %c0_i32_0 = arith.constant 0 : i32
    %c0_i32_1 = arith.constant 0 : i32
    return %arg0, %c0_i32, %c0_i32_0 : i32, i32, i32
  }
  func.func @transform_3(%arg0: i32) -> (i32, i32, i32) {
    %c0_i32 = arith.constant 0 : i32
    %c0_i32_0 = arith.constant 0 : i32
    %c0_i32_1 = arith.constant 0 : i32
    return %arg0, %c0_i32, %c0_i32_0 : i32, i32, i32
  }
  func.func @transform_4(%arg0: i32) -> (i32, i32, i32) {
    %c0_i32 = arith.constant 0 : i32
    %c0_i32_0 = arith.constant 0 : i32
    %c0_i32_1 = arith.constant 0 : i32
    return %arg0, %c0_i32, %c0_i32_0 : i32, i32, i32
  }
  func.func @transform_5(%arg0: i32) -> (i32, i32, i32) {
    %c0_i32 = arith.constant 0 : i32
    %c0_i32_0 = arith.constant 0 : i32
    %c0_i32_1 = arith.constant 0 : i32
    return %arg0, %c0_i32, %c0_i32_0 : i32, i32, i32
  }
  func.func @transform_6(%arg0: i32) -> (i32, i32, i32) {
    %c0_i32 = arith.constant 0 : i32
    %c0_i32_0 = arith.constant 0 : i32
    %c0_i32_1 = arith.constant 0 : i32
    return %arg0, %c0_i32, %c0_i32_0 : i32, i32, i32
  }
}

</mosaic_0001>

<bundles_post_ra>
// kernel: tpu_custom_call.1
= control target key start
LH: loop header
LB: loop body
LE: loop exit
PB: predicated region body
PF: predicated region fallthrough
CT: control target
= control target key end

     0   :  { %s4768_s0 = inlined_call_operand.hbm [shape: bf16[128,128], index: 0, kind: input, shape index: {}]   ;;  %s4769_s1 = inlined_call_operand.hbm [shape: bf16[128,128], index: 1, kind: input, shape index: {}]   ;;  %s4770_s2 = inlined_call_operand.hbm [shape: f32[2,128,128], index: 2, kind: input, shape index: {}]   ;;  %s4771_s3 = inlined_call_operand.hbm [shape: bf16[2,256,384], index: 3, kind: input, shape index: {}]   ;;  %s4772_s4 = inlined_call_operand.hbm [shape: bf16[2,128,128], index: 4, kind: input, shape index: {}]   ;;  %s4773_s5 = inlined_call_operand.hbm [shape: f32[2,1,384], index: 5, kind: input, shape index: {}]   ;;  %s4774_s6 = inlined_call_operand.hbm [shape: f32[2,128,128], index: 6, kind: output, shape index: {}]  }
   0x1   :  { %4778 = sst [smem:[#allocation26_spill]] %s4769_s1 }
   0x2   :  { %4779 = sst [smem:[#allocation27_spill]] %s4770_s2 }
   0x3   :  { %4780 = sst [smem:[#allocation28_spill]] %s4772_s4 }
   0x4   :  { %11 = vsyncpa [#allocation5], 0 }
   0x5   :  { %12 = vsyncpa [#allocation8], 0 }
   0x6   :  { %14 = vsyncpa [#allocation8 + $0x1], 0 }
   0x7   :  { %15 = vsyncpa [#allocation11], 0 }
   0x8   :  { %17 = vsyncpa [#allocation11 + $0x1], 0 }
   0x9   :  { %18 = vsyncpa [#allocation6], 0 }
   0xa   :  { %20 = vsyncpa [#allocation6 + $0x1], 0  ;;  %s3597_s21 = smov 0   ;;  %s3599_s22 = smov 0  }
   0xb   :  { %s3601_s23 = smov 0   ;;  %s3603_s24 = smov 0  }
   0xc LB: > { %4781 = sst [smem:[#allocation24_spill]] %s3546_s23  ;;  %s3618_s25 = sadd.s32 1, %s3550_s24   ;;  %s3550_s24 = sphi %s3603_s24, %s4843_s24   ;;  %s3546_s23 = sphi %s3601_s23, %s4840_s23   ;;  %s3542_s22 = sphi %s3599_s22, %s4842_s22   ;;  %s3538_s21 = sphi %s3597_s21, %s4841_s21  }
   0xd   : > { %s54_s26 = sadd.s32 1, %s3546_s23  ;;  %s51_s27 = ssub.s32 %s3550_s24, %s3618_s25 }
   0xe   : > { %p61_p0 = scmp.ne.s32.totalorder %s3546_s23, %s3542_s22  ;;  %p52_p1 = scmp.eq.s32.totalorder %s51_s27, 0 }
   0xf   : > { %p62_p2 = scmp.eq.s32.totalorder %s3550_s24, 0  ;;  %p3067_p4 = scmp.lt.s32.totalorder %s3550_s24, 2 }
  0x10   : > { %s3629_s28 = scalar_select %p52_p1, %s3546_s23, %s54_s26  }
  0x11   : > { %p63_p5 = por %p62_p2, %p61_p0  ;;  %s209_s29 = sand.u32 1, %s3550_s24  }
  0x12   : > { %4782 = sst [smem:[#allocation25_spill]] %s3629_s28  ;;  %s3636_s30 = sand.u32 1, %s3546_s23  }
  0x13   : > { %s2548_s7 = sshll.u32 %s3636_s30, 7  ;;  %s2918_s8 = sshll.u32 %s3550_s24, 7 }
  0x14   : > { %s4783_s2 = sld [smem:[#allocation27_spill]]  ;;  %s213_s13 = scalar_lea.vmem [#allocation7], %s2548_s7 }
  0x15   : > { %s221_s14 = sshll.u32 %s213_s13, 4  ;;  %p3645_p6 = pnand %p3067_p4, %p63_p5  ;;  %s222_s14 = int_to_ptr.vmem [resolvable:$true] %s221_s14 }
  0x16   : > { %s3651_s16 = scalar_lea.sflag [#allocation8], %s209_s29 }
  0x17   : > { %p3304_p8 = pneg %p3645_p6 }
  0x1a   : > { %s218_s11 = scalar_lea.hbm %s4783_s2, %s2918_s8  ;;  %s3307_s26 = scalar_lea.hbm %s4783_s2, 256 }
  0x1b   : > { %s219_s12 = sshll.u32 %s218_s11, 4  ;;  %s220_s12 = int_to_ptr.hbm [resolvable:$true] %s219_s12 }
  0x1c   : > { %s3300_s17 = sshra.s32 %s220_s12, 4  ;;  %s3301_s17 = int_to_ptr.hbm [resolvable:$true] %s3300_s17 }
  0x1d   : > { %s3302_s18 = scalar_lea.hbm %s3301_s17, 128  ;;  %p3308_p11 = scmp.lt.s32.totalorder %s3301_s17, %s4783_s2 }
  0x1e   : > { %p3303_p7 = scmp.ne.s32.totalorder %s3301_s17, %s3302_s18  ;;  %p3309_p12 = scmp.lt.s32.totalorder %s3307_s26, %s3302_s18 }
  0x20   : > { %p3305_p9 = pnand %p3304_p8, %p3303_p7  ;;  %p3310_p13 = por %p3309_p12, %p3308_p11 }
  0x22   : > { %p3306_p10 = pneg %p3305_p9 }
  0x24   : > { %p3311_p1 = pnand %p3310_p13, %p3306_p10 }
  0x26   : > { %3314 = shalt.err (!%p3311_p1)
}
  0x27   : > { %s3552_s8 = smov 128   ;;  %s3553_s9 = smov 8  }
  0x28   : > { %3052 = dma.hbm_to_vmem [thread:$0]  (!%p3645_p6), %s220_s12, 2048, %s222_s14, %s3651_s16, %s3552_s8, %s3552_s8, %s3553_s9  }
  0x29   : > { %s2552_s10 = sshll.u32 %s3636_s30, 6  ;;  %s2919_s11 = sshll.u32 %s3550_s24, 6 }
  0x2a   : > { %s4785_s4 = sld [smem:[#allocation28_spill]]  ;;  %s257_s18 = scalar_lea.vmem [#allocation10], %s2552_s10 }
  0x2b   : > { %s265_s20 = sshll.u32 %s257_s18, 4  ;;  %s3674_s27 = scalar_lea.sflag [#allocation11], %s209_s29  ;;  %s266_s20 = int_to_ptr.vmem [resolvable:$true] %s265_s20 }
  0x30   : > { %s262_s17 = scalar_lea.hbm %s4785_s4, %s2919_s11  ;;  %s3337_s8 = scalar_lea.hbm %s4785_s4, 128 }
  0x31   : > { %s263_s26 = sshll.u32 %s262_s17, 4  ;;  %s264_s26 = int_to_ptr.hbm [resolvable:$true] %s263_s26 }
  0x32   : > { %s3330_s7 = sshra.s32 %s264_s26, 4  ;;  %s3331_s7 = int_to_ptr.hbm [resolvable:$true] %s3330_s7 }
  0x33   : > { %s3332_s2 = scalar_lea.hbm %s3331_s7, 64  ;;  %p3338_p7 = scmp.lt.s32.totalorder %s3331_s7, %s4785_s4 }
  0x34   : > { %p3333_p2 = scmp.ne.s32.totalorder %s3331_s7, %s3332_s2  ;;  %p3339_p9 = scmp.lt.s32.totalorder %s3337_s8, %s3332_s2 }
  0x36   : > { %p3335_p4 = pnand %p3333_p2, %p3304_p8  ;;  %p3340_p10 = por %p3339_p9, %p3338_p7 }
  0x38   : > { %p3336_p5 = pneg %p3335_p4 }
  0x3a   : > { %p3341_p11 = pnand %p3340_p10, %p3336_p5 }
  0x3c   : > { %3344 = shalt.err (!%p3341_p11)
}
  0x3d   : > { %s4775_s29 = smov 64   ;;  %s4776_s11 = smov 4  }
  0x3e   : > { %3058 = dma.hbm_to_vmem [thread:$0]  (!%p3645_p6), %s264_s26, 1024, %s266_s20, %s3674_s27, %s4775_s29, %s4775_s29, %s4776_s11  }
  0x3f   : > { %s3692_s2 = sadd.s32 4294967295, %s3550_s24   ;;  %s2544_s13 = sadd.s32 4294967294, %s3550_s24  }
  0x40   : > { %p67_p12 = scmp.ne.s32.totalorder %s3542_s22, %s3538_s21  ;;  %p68_p13 = scmp.eq.s32.totalorder %s3692_s2, 0 }
  0x41   : > { %p169_p1 = scmp.eq.s32.totalorder %s3692_s2, 1  ;;  %p175_p2 = scmp.eq.s32.totalorder %s2544_s13, 1 }
  0x42   : > { %p2545_p4 = scmp.ge.s32.totalorder %s3550_s24, 1  ;;  %p3702_p5 = por %p68_p13, %p67_p12 }
  0x43   : > { %p3709_p7 = por %p169_p1, %p61_p0  ;;  %p3713_p9 = por %p175_p2, %p67_p12 }
  0x44   : > { %p182_p10 = scmp.lt.s32.totalorder %s3550_s24, 3  ;;  %s4789_s1 = sld [smem:[#allocation26_spill]] }
  0x45   : > { %s3025_s14 = smul.u32 384, %s3636_s30  ;;  %s3556_s8 = smov [#allocation4]  }
  0x46   : > { %p3722_p3 = pnand %p2545_p4, %p182_p10  ;;  %s195_s9 = sshll.u32 %s3556_s8, 4  ;;  %s196_s9 = int_to_ptr.vmem [resolvable:$true] %s195_s9 }
  0x47   : > { %s3026_s10 = smul.u32 384, %s3550_s24  ;;  %s235_s13 = scalar_lea.vmem [#allocation9], %s3025_s14 }
  0x48   : > { %p3045_p0 = pneg %p3722_p3  ;;  %s243_s29 = sshll.u32 %s235_s13, 4  ;;  %s244_s29 = int_to_ptr.vmem [resolvable:$true] %s243_s29 }
  0x49   : > { %s240_s11 = scalar_lea.hbm %s4771_s3, %s3026_s10  ;;  %s4792_s4 = smov 64  }
  0x4a   : > { %s193_s7 = sshll.u32 %s4789_s1, 4  ;;  %p3046_p12 = pnand %p3045_p0, %p68_p13  ;;  %s194_s7 = int_to_ptr.hbm [resolvable:$true] %s193_s7 }
  0x4b   : > { %s4791_s1 = smov 4   ;;  %s241_s28 = sshll.u32 %s240_s11, 4  ;;  %s242_s28 = int_to_ptr.hbm [resolvable:$true] %s241_s28 }
  0x4c   : > { %3048 = dma.hbm_to_vmem [thread:$0]  (!%p3046_p12), %s194_s7, 1024, %s196_s9, [#allocation5], %s4792_s4, %s4792_s4, %s4791_s1  }
  0x4d   : > { %s3390_s23 = sshra.s32 %s242_s28, 4  ;;  %s3397_s20 = scalar_lea.hbm %s4771_s3, 768  ;;  %s3391_s23 = int_to_ptr.hbm [resolvable:$true] %s3390_s23 }
  0x4e   : > { %s3392_s8 = scalar_lea.hbm %s3391_s23, 384  ;;  %p3398_p10 = scmp.lt.s32.totalorder %s3391_s23, %s4771_s3 }
  0x4f   : > { %p3393_p1 = scmp.ne.s32.totalorder %s3391_s23, %s3392_s8  ;;  %p3399_p0 = scmp.lt.s32.totalorder %s3397_s20, %s3392_s8 }
  0x51   : > { %p3395_p2 = pnand %p3393_p1, %p3304_p8  ;;  %p3400_p12 = por %p3399_p0, %p3398_p10 }
  0x53   : > { %p3396_p4 = pneg %p3395_p2 }
  0x55   : > { %p3401_p11 = pnand %p3400_p12, %p3396_p4 }
  0x57   : > { %3404 = shalt.err (!%p3401_p11)
}
  0x58   : > { %s3557_s1 = smov 192   ;;  %s3558_s4 = smov 12  }
  0x59   : > { %3055 = dma.hbm_to_vmem [thread:$0]  (!%p3645_p6), %s242_s28, 6144, %s244_s29, %s3651_s16, %s3557_s1, %s3557_s1, %s3558_s4  }
  0x5a   : > { %s3027_s11 = smul.u32 3, %s3636_s30  ;;  %s3427_s16 = scalar_lea.hbm %s4773_s5, 6 }
  0x5b   : > { %s3028_s7 = smul.u32 3, %s3550_s24 }
  0x5c   : > { %s279_s23 = scalar_lea.vmem [#allocation12], %s3027_s11 }
  0x5d   : > { %s283_s13 = scalar_lea.hbm %s4773_s5, %s3028_s7  ;;  %s287_s8 = sshll.u32 %s279_s23, 4  ;;  %s288_s8 = int_to_ptr.vmem [resolvable:$true] %s287_s8 }
  0x5e   : > { %s285_s20 = sshll.u32 %s283_s13, 4  ;;  %s286_s20 = int_to_ptr.hbm [resolvable:$true] %s285_s20 }
  0x5f   : > { %s3420_s10 = sshra.s32 %s286_s20, 4  ;;  %s3421_s10 = int_to_ptr.hbm [resolvable:$true] %s3420_s10 }
  0x60   : > { %s3422_s26 = scalar_lea.hbm %s3421_s10, 3  ;;  %p3428_p4 = scmp.lt.s32.totalorder %s3421_s10, %s4773_s5 }
  0x61   : > { %p3423_p11 = scmp.ne.s32.totalorder %s3421_s10, %s3422_s26  ;;  %p3429_p10 = scmp.lt.s32.totalorder %s3427_s16, %s3422_s26 }
  0x63   : > { %p3425_p1 = pnand %p3423_p11, %p3304_p8  ;;  %p3430_p0 = por %p3429_p10, %p3428_p4 }
  0x65   : > { %p3426_p2 = pneg %p3425_p1 }
  0x67   : > { %p3431_p12 = pnand %p3430_p0, %p3426_p2 }
  0x69   : > { %3434 = shalt.err (!%p3431_p12)
}
  0x6a   : > { %3061 = dma.hbm_to_vmem [thread:$0]  (!%p3645_p6), %s286_s20, 48, %s288_s8, %s3674_s27  }
  0x6b   : > { %296 = sbr.rel (%p3722_p3) target bundleno = 1289 (0x509), region = 40 }
  0x70   : > { %3519 = dma.done.wait (%p68_p13), [#allocation5], 1024  }
  0x71   : > { %3521 = vsyncadd (%p68_p13), [#allocation5], 4294966272  ;;  %s303_s4 = sand.u32 1, %s3692_s2   ;;  %s3775_s11 = sand.u32 1, %s3542_s22  }
  0x72   : > { %s2557_s7 = sshll.u32 %s3775_s11, 7  ;;  %s304_s15 = scalar_lea.sflag [#allocation8], %s303_s4 }
  0x73   : > { %s3778_s9 = scalar_lea.vmem [#allocation7], %s2557_s7 }
  0x74   : > { %3523 = dma.done.wait (%p3702_p5), %s304_s15, 8192  }
  0x75   : > { %3525 = vsyncadd (%p3702_p5), %s304_s15, 4294959104  ;;  %s3029_s27 = smul.u32 384, %s3775_s11  ;;  %s2558_s12 = sshll.u32 %s3775_s11, 6 }
  0x76   : > { %s324_s13 = scalar_lea.sflag [#allocation11], %s303_s4  ;;  %s3788_s23 = scalar_lea.vmem [#allocation10], %s2558_s12 }
  0x77   : > { %s3786_s14 = scalar_lea.vmem [#allocation9], %s3029_s27 }
  0x78   : > { %3527 = dma.done.wait (%p3702_p5), %s324_s13, 1072  }
  0x79   : > { %3529 = vsyncadd (%p3702_p5), %s324_s13, 4294966224  ;;  %s3030_s8 = smul.u32 3, %s3775_s11  ;;  %s3797_s10 = scalar_lea.vmem [#allocation13], %s2557_s7 }
  0x7a   : > { %p4793_p3 = scmp.ne.s32.totalorder %s3692_s2, 0 }
  0x7b   : > { %s3795_s20 = scalar_lea.vmem [#allocation12], %s3030_s8 }
  0x7c   : > { %383 = sbr.rel (%p4793_p3) target bundleno = 150 (0x96), region = 64 }
  0x81   : > { %s391_s30 = sshll.u32 %s4768_s0, 4  ;;  %s3559_s16 = smov [#allocation2]   ;;  %s392_s30 = int_to_ptr.hbm [resolvable:$true] %s391_s30 }
  0x82   : > { %s393_s29 = sshll.u32 %s3559_s16, 4  ;;  %s394_s29 = int_to_ptr.vmem [resolvable:$true] %s393_s29 }
  0x83   : > { %396 = dma.hbm_to_vmem [thread:$0]  %s392_s30, 1024, %s394_s29, [#allocation14] }
  0x84   : > { %3530 = dma.done.wait [#allocation14], 1024 }
  0x85   : > { %3531 = vsyncadd [#allocation14], 4294966272  ;;  %v401_v0 = vld [vmem:[#allocation4] sm:$0xf]  ;;  %v402_v1 = vld [vmem:[#allocation4 + $0x4] sm:$0xf] }
  0x86   : > { %v403_v2 = vld [vmem:[#allocation4 + $0x8] sm:$0xf]  ;;  %417 = vst [vmem:[#allocation3] sm:$0xf] %v401_v0  ;;  %v404_v3 = vld [vmem:[#allocation4 + $0xc] sm:$0xf] }
  0x87   : > { %418 = vst [vmem:[#allocation3 + $0x8] sm:$0xf] %v402_v1  ;;  %v405_v4 = vld [vmem:[#allocation4 + $0x10] sm:$0xf]  ;;  %v406_v5 = vld [vmem:[#allocation4 + $0x14] sm:$0xf] }
  0x88   : > { %419 = vst [vmem:[#allocation3 + $0x10] sm:$0xf] %v403_v2  ;;  %v407_v6 = vld [vmem:[#allocation4 + $0x18] sm:$0xf]  ;;  %v408_v7 = vld [vmem:[#allocation4 + $0x1c] sm:$0xf] }
  0x89   : > { %420 = vst [vmem:[#allocation3 + $0x18] sm:$0xf] %v404_v3  ;;  %v409_v8 = vld [vmem:[#allocation4 + $0x20] sm:$0xf]  ;;  %v410_v9 = vld [vmem:[#allocation4 + $0x24] sm:$0xf] }
  0x8a   : > { %421 = vst [vmem:[#allocation3 + $0x20] sm:$0xf] %v405_v4  ;;  %v411_v10 = vld [vmem:[#allocation4 + $0x28] sm:$0xf]  ;;  %v412_v11 = vld [vmem:[#allocation4 + $0x2c] sm:$0xf] }
  0x8b   : > { %422 = vst [vmem:[#allocation3 + $0x28] sm:$0xf] %v406_v5  ;;  %v413_v12 = vld [vmem:[#allocation4 + $0x30] sm:$0xf]  ;;  %v414_v13 = vld [vmem:[#allocation4 + $0x34] sm:$0xf] }
  0x8c   : > { %423 = vst [vmem:[#allocation3 + $0x30] sm:$0xf] %v407_v6  ;;  %v415_v14 = vld [vmem:[#allocation4 + $0x38] sm:$0xf]  ;;  %v416_v15 = vld [vmem:[#allocation4 + $0x3c] sm:$0xf] }
  0x8d   : > { %424 = vst [vmem:[#allocation3 + $0x38] sm:$0xf] %v408_v7 }
  0x8e   : > { %425 = vst [vmem:[#allocation3 + $0x40] sm:$0xf] %v409_v8 }
  0x8f   : > { %426 = vst [vmem:[#allocation3 + $0x48] sm:$0xf] %v410_v9 }
  0x90   : > { %427 = vst [vmem:[#allocation3 + $0x50] sm:$0xf] %v411_v10 }
  0x91   : > { %428 = vst [vmem:[#allocation3 + $0x58] sm:$0xf] %v412_v11 }
  0x92   : > { %429 = vst [vmem:[#allocation3 + $0x60] sm:$0xf] %v413_v12 }
  0x93   : > { %430 = vst [vmem:[#allocation3 + $0x68] sm:$0xf] %v414_v13 }
  0x94   : > { %431 = vst [vmem:[#allocation3 + $0x70] sm:$0xf] %v415_v14 }
  0x95   : > { %432 = vst [vmem:[#allocation3 + $0x78] sm:$0xf] %v416_v15 }
  0x96 PF: > { %v2711_v16 = vld [vmem:[%s3786_s14 + $0xa8] sm:$0xf]  ;;  %v2966_v17 = vld [vmem:[%s3786_s14 + $0xb0] sm:$0xf0]  ;;  %v2699_v18 = vld [vmem:[%s3786_s14 + $0x90] sm:$0xf] }
  0x97   : > { %v2712_v19 = vor.u32 %v2966_v17, %v2711_v16  ;;  %v2963_v20 = vld [vmem:[%s3786_s14 + $0x98] sm:$0xf0]  ;;  %v2807_v21 = vld [vmem:[%s3786_s14 + $0x168] sm:$0xf]  ;;  %v2990_v22 = vld [vmem:[%s3786_s14 + $0x170] sm:$0xf0] }
  0x98   : > { %v3810_v23 = vor.u32 %v2990_v22, %v2807_v21  ;;  %v2795_v24 = vld [vmem:[%s3786_s14 + $0x150] sm:$0xf]  ;;  %v2700_v25 = vor.u32 %v2963_v20, %v2699_v18  ;;  %v2987_v26 = vld [vmem:[%s3786_s14 + $0x158] sm:$0xf0]  ;;  %v2687_v27 = vld [vmem:[%s3786_s14 + $0x78] sm:$0xf] }
  0x99   : > { %3001 = vmatpush.bf16.msra.mxu3 %v2712_v19  ;;  %913 = vmatpush.bf16.msra.mxu0 %v2712_v19  ;;  %v2960_v28 = vld [vmem:[%s3786_s14 + $0x80] sm:$0xf0]  ;;  %v3817_v29 = vor.u32 %v2987_v26, %v2795_v24  ;;  %v2783_v30 = vld [vmem:[%s3786_s14 + $0x138] sm:$0xf]  ;;  %v2675_v33 = vld [vmem:[%s3786_s14 + $0x60] sm:$0xf] }
  0x9a   : > { %3009 = vmatpush.bf16.msra.mxu1 %v3810_v23  ;;  %v2984_v31 = vld [vmem:[%s3786_s14 + $0x140] sm:$0xf0]  ;;  %v2688_v32 = vor.u32 %v2960_v28, %v2687_v27  ;;  %v2957_v34 = vld [vmem:[%s3786_s14 + $0x68] sm:$0xf0]  ;;  %v2771_v36 = vld [vmem:[%s3786_s14 + $0x120] sm:$0xf] }
  0x9b   : > { %v3824_v35 = vor.u32 %v2984_v31, %v2783_v30  ;;  %v2981_v37 = vld [vmem:[%s3786_s14 + $0x128] sm:$0xf0]  ;;  %v2676_v38 = vor.u32 %v2957_v34, %v2675_v33  ;;  %v437_v39 = vld [vmem:[%s3778_s9 + $0x20] sm:$0xff]  ;;  %v2663_v41 = vld [vmem:[%s3786_s14 + $0x48] sm:$0xf]  ;;  %s3000_s19 = sshll.u32 %s3692_s2, 7 }
  0x9c   : > { %v438_v40 = vld [vmem:[%s3778_s9 + $0x28] sm:$0xff]  ;;  %v2954_v42 = vld [vmem:[%s3786_s14 + $0x50] sm:$0xf0]  ;;  %v3833_v43 = vor.u32 %v2981_v37, %v2771_v36  ;;  %v453_v44 = vpack.c.bf16 %v437_v39, %v437_v39  ;;  %v440_v49 = vld [vmem:[%s3778_s9 + $0x38] sm:$0xff]  ;;  %s2392_s7 = scalar_lea.hbm %s4774_s6, %s3000_s19  ;;  %s2393_s15 = sshll.u32 %s3797_s10, 4  ;;  %s2394_s15 = int_to_ptr.vmem [resolvable:$true] %s2393_s15 }
  0x9d   : > { %3002 = vmatpush.bf16.msra.mxu3 %v2700_v25  ;;  %914 = vmatpush.bf16.msra.mxu0 %v2700_v25  ;;  %v454_v45 = vpack.c.bf16 %v438_v40, %v438_v40  ;;  %v439_v46 = vld [vmem:[%s3778_s9 + $0x30] sm:$0xff]  ;;  %v2759_v47 = vld [vmem:[%s3786_s14 + $0x108] sm:$0xf]  ;;  %v456_v51 = vpack.c.bf16 %v440_v49, %v440_v49  ;;  %v2664_v52 = vor.u32 %v2954_v42, %v2663_v41  ;;  %v2951_v54 = vld [vmem:[%s3786_s14 + $0x38] sm:$0xf0]  ;;  %s2395_s27 = sshll.u32 %s2392_s7, 4  ;;  %s2396_s27 = int_to_ptr.hbm [resolvable:$true] %s2395_s27 }
  0x9e   : > { %3010 = vmatpush.bf16.msra.mxu1 %v3817_v29  ;;  %v2978_v48 = vld [vmem:[%s3786_s14 + $0x110] sm:$0xf0]  ;;  %v455_v50 = vpack.c.bf16 %v439_v46, %v439_v46  ;;  %469 = vst [vmem:[#allocation3 + $0x24] sm:$0xf] %v453_v44  ;;  %v2651_v53 = vld [vmem:[%s3786_s14 + $0x30] sm:$0xf] }
  0x9f   : > { %470 = vst [vmem:[#allocation3 + $0x2c] sm:$0xf] %v454_v45  ;;  %v3842_v55 = vor.u32 %v2978_v48, %v2759_v47  ;;  %v2747_v56 = vld [vmem:[%s3786_s14 + $0xf0] sm:$0xf]  ;;  %v2975_v57 = vld [vmem:[%s3786_s14 + $0xf8] sm:$0xf0]  ;;  %v2652_v58 = vor.u32 %v2951_v54, %v2651_v53 }
  0xa0   : > { %471 = vst [vmem:[#allocation3 + $0x34] sm:$0xf] %v455_v50  ;;  %v2639_v59 = vld [vmem:[%s3786_s14 + $0x18] sm:$0xf]  ;;  %v2948_v60 = vld [vmem:[%s3786_s14 + $0x20] sm:$0xf0]  ;;  %v2748_v61 = vor.u32 %v2975_v57, %v2747_v56 }
  0xa1   : > { %3003 = vmatpush.bf16.msra.mxu3 %v2688_v32  ;;  %915 = vmatpush.bf16.msra.mxu0 %v2688_v32  ;;  %472 = vst [vmem:[#allocation3 + $0x3c] sm:$0xf] %v456_v51  ;;  %v2735_v62 = vld [vmem:[%s3786_s14 + $0xd8] sm:$0xf]  ;;  %v2972_v63 = vld [vmem:[%s3786_s14 + $0xe0] sm:$0xf0]  ;;  %v2640_v0 = vor.u32 %v2948_v60, %v2639_v59 }
  0xa2   : > { %3011 = vmatpush.bf16.msra.mxu1 %v3824_v35  ;;  %v2627_v1 = vld [vmem:[%s3786_s14] sm:$0xf]  ;;  %v2945_v2 = vld [vmem:[%s3786_s14 + $0x8] sm:$0xf0]  ;;  %v2736_v3 = vor.u32 %v2972_v63, %v2735_v62  ;;  %v2933_v8 = vld [vmem:[#allocation3 + $0x24] sm:$0xf0] }
  0xa3   : > { %v2723_v4 = vld [vmem:[%s3786_s14 + $0xc0] sm:$0xf]  ;;  %v2969_v5 = vld [vmem:[%s3786_s14 + $0xc8] sm:$0xf0]  ;;  %v2628_v7 = vor.u32 %v2945_v2, %v2627_v1  ;;  %v2929_v19 = vld [vmem:[#allocation3 + $0x4] sm:$0xf0] }
  0xa4   : > { %v2579_v6 = vld [vmem:[#allocation3 + $0x20] sm:$0xf]  ;;  %v442_v10 = vld [vmem:[%s3778_s9 + $0x48] sm:$0xff]  ;;  %v2724_v11 = vor.u32 %v2969_v5, %v2723_v4  ;;  %v2587_v21 = vld [vmem:[#allocation3 + $0x30] sm:$0xf]  ;;  %s2381_s2 = scalar_lea.sflag [#allocation6], %s3775_s11 }
  0xa5   : > { %3004 = vmatpush.bf16.msra.mxu3 %v2676_v38  ;;  %916 = vmatpush.bf16.msra.mxu0 %v2676_v38  ;;  %v441_v9 = vld [vmem:[%s3778_s9 + $0x40] sm:$0xff]  ;;  %v458_v15 = vpack.c.bf16 %v442_v10, %v442_v10  ;;  %v3857_v16 = vor.u32 %v2933_v8, %v2579_v6  ;;  %v2935_v22 = vld [vmem:[#allocation3 + $0x34] sm:$0xf0]  ;;  %v443_v24 = vld [vmem:[%s3778_s9 + $0x50] sm:$0xff]  ;;  %s3488_s12 = sshra.s32 %s2396_s27, 4  ;;  %s3494_s8 = scalar_lea.hbm %s4774_s6, 256  ;;  %s3489_s12 = int_to_ptr.hbm [resolvable:$true] %s3488_s12 }
  0xa6   : > { %3012 = vmatpush.bf16.msra.mxu1 %v3833_v43  ;;  %v2932_v12 = vld [vmem:[#allocation3 + $0x24] sm:$0xf]  ;;  %v2581_v13 = vld [vmem:[#allocation3 + $0x28] sm:$0xf0]  ;;  %v457_v14 = vpack.c.bf16 %v441_v9, %v441_v9  ;;  %v2563_v18 = vld [vmem:[#allocation3] sm:$0xf]  ;;  %v459_v27 = vpack.c.bf16 %v443_v24, %v443_v24  ;;  %v3872_v30 = vor.u32 %v2935_v22, %v2587_v21  ;;  %p3495_p5 = scmp.lt.s32.totalorder %s3489_s12, %s4774_s6 }
  0xa7   : > { %v3859_v17 = vor.u32 %v2932_v12, %v2581_v13  ;;  %474 = vst [vmem:[#allocation3 + $0x4c] sm:$0xf] %v458_v15  ;;  %v3864_v20 = vor.u32 %v2929_v19, %v2563_v18  ;;  %v444_v25 = vld [vmem:[%s3778_s9 + $0x58] sm:$0xff]  ;;  %v2934_v26 = vld [vmem:[#allocation3 + $0x34] sm:$0xf]  ;;  %v433_v36 = vld [vmem:[%s3778_s9] sm:$0xff] }
  0xa8   : > { %473 = vst [vmem:[#allocation3 + $0x44] sm:$0xf] %v457_v14  ;;  %v460_v28 = vpack.c.bf16 %v444_v25, %v444_v25  ;;  %v2571_v31 = vld [vmem:[#allocation3 + $0x10] sm:$0xf]  ;;  %v2931_v32 = vld [vmem:[#allocation3 + $0x14] sm:$0xf0]  ;;  %v449_v41 = vpack.c.bf16 %v433_v36, %v433_v36 }
  0xa9   : > { %3005 = vmatpush.bf16.msra.mxu3 %v2664_v52  ;;  %917 = vmatpush.bf16.msra.mxu0 %v2664_v52  ;;  %475 = vst [vmem:[#allocation3 + $0x54] sm:$0xf] %v459_v27  ;;  %v3879_v33 = vor.u32 %v2931_v32, %v2571_v31  ;;  %v2595_v34 = vld [vmem:[#allocation3 + $0x40] sm:$0xf]  ;;  %v434_v37 = vld [vmem:[%s3778_s9 + $0x8] sm:$0xff]  ;;  %v435_v10 = vld [vmem:[%s3778_s9 + $0x10] sm:$0xff] }
  0xaa   : > { %3013 = vmatpush.bf16.msra.mxu1 %v3842_v55  ;;  %476 = vst [vmem:[#allocation3 + $0x5c] sm:$0xf] %v460_v28  ;;  %v445_v38 = vld [vmem:[%s3778_s9 + $0x60] sm:$0xff]  ;;  %v450_v42 = vpack.c.bf16 %v434_v37, %v434_v37  ;;  %v2989_v48 = vld [vmem:[%s3786_s14 + $0x16c] sm:$0xf]  ;;  %v447_v12 = vld [vmem:[%s3778_s9 + $0x70] sm:$0xff]  ;;  %v451_v15 = vpack.c.bf16 %v435_v10, %v435_v10 }
  0xab   : > { %v461_v44 = vpack.c.bf16 %v445_v38, %v445_v38  ;;  %465 = vst [vmem:[#allocation3 + $0x4] sm:$0xf] %v449_v41  ;;  %v2809_v49 = vld [vmem:[%s3786_s14 + $0x174] sm:$0xf0]  ;;  %v2986_v51 = vld [vmem:[%s3786_s14 + $0x154] sm:$0xf]  ;;  %v463_v21 = vpack.c.bf16 %v447_v12, %v447_v12 }
  0xac   : > { %466 = vst [vmem:[#allocation3 + $0xc] sm:$0xf] %v450_v42  ;;  %v2812_v50 = vor.u32 %v2989_v48, %v2809_v49  ;;  %v2797_v52 = vld [vmem:[%s3786_s14 + $0x15c] sm:$0xf0]  ;;  %v2965_v54 = vld [vmem:[%s3786_s14 + $0xac] sm:$0xf] }
  0xad   : > { %3006 = vmatpush.bf16.msra.mxu3 %v2652_v58  ;;  %918 = vmatpush.bf16.msra.mxu0 %v2652_v58  ;;  %477 = vst [vmem:[#allocation3 + $0x64] sm:$0xf] %v461_v44  ;;  %v2800_v53 = vor.u32 %v2986_v51, %v2797_v52  ;;  %v2983_v56 = vld [vmem:[%s3786_s14 + $0x13c] sm:$0xf]  ;;  %v2785_v58 = vld [vmem:[%s3786_s14 + $0x144] sm:$0xf0] }
  0xae   : > { %3014 = vmatpush.bf16.msra.mxu1 %v2748_v61  ;;  %v2597_v40 = vld [vmem:[#allocation3 + $0x48] sm:$0xf0]  ;;  %v2962_v59 = vld [vmem:[%s3786_s14 + $0x94] sm:$0xf]  ;;  %v2701_v60 = vld [vmem:[%s3786_s14 + $0x9c] sm:$0xf0]  ;;  %v2788_v1 = vor.u32 %v2983_v56, %v2785_v58 }
  0xaf   : > { %v2936_v39 = vld [vmem:[#allocation3 + $0x44] sm:$0xf]  ;;  %v2704_v63 = vor.u32 %v2962_v59, %v2701_v60  ;;  %v2959_v2 = vld [vmem:[%s3786_s14 + $0x7c] sm:$0xf]  ;;  %v2773_v5 = vld [vmem:[%s3786_s14 + $0x12c] sm:$0xf0] }
  0xb0   : > { %v3888_v47 = vor.u32 %v2936_v39, %v2597_v40  ;;  %v2980_v4 = vld [vmem:[%s3786_s14 + $0x124] sm:$0xf]  ;;  %v2603_v6 = vld [vmem:[#allocation3 + $0x50] sm:$0xf]  ;;  %v2938_v13 = vld [vmem:[#allocation3 + $0x54] sm:$0xf] }
  0xb1   : > { %3007 = vmatpush.bf16.msra.mxu3 %v2640_v0  ;;  %919 = vmatpush.bf16.msra.mxu0 %v2640_v0  ;;  %v2776_v9 = vor.u32 %v2980_v4, %v2773_v5  ;;  %v2605_v14 = vld [vmem:[#allocation3 + $0x58] sm:$0xf0]  ;;  %467 = vst [vmem:[#allocation3 + $0x14] sm:$0xf] %v451_v15  ;;  %v2956_v28 = vld [vmem:[%s3786_s14 + $0x64] sm:$0xf] }
  0xb2   : > { %3015 = vmatpush.bf16.msra.mxu1 %v2736_v3  ;;  %v448_v19 = vld [vmem:[%s3778_s9 + $0x78] sm:$0xff]  ;;  %v3915_v25 = vor.u32 %v2938_v13, %v2605_v14  ;;  %479 = vst [vmem:[#allocation3 + $0x74] sm:$0xf] %v463_v21  ;;  %v2677_v31 = vld [vmem:[%s3786_s14 + $0x6c] sm:$0xf0] }
  0xb3   : > { %v2565_v62 = vld [vmem:[#allocation3 + $0x8] sm:$0xf0]  ;;  %v464_v22 = vpack.c.bf16 %v448_v19, %v448_v19  ;;  %v2974_v32 = vld [vmem:[%s3786_s14 + $0xf4] sm:$0xf]  ;;  %v2665_v37 = vld [vmem:[%s3786_s14 + $0x54] sm:$0xf0] }
  0xb4   : > { %v2953_v36 = vld [vmem:[%s3786_s14 + $0x4c] sm:$0xf]  ;;  %v2971_v39 = vld [vmem:[%s3786_s14 + $0xdc] sm:$0xf]  ;;  %v2737_v40 = vld [vmem:[%s3786_s14 + $0xe4] sm:$0xf0] }
  0xb5   : > { %3008 = vmatpush.bf16.msra.mxu3 %v2628_v7  ;;  %920 = vmatpush.bf16.msra.mxu0 %v2628_v7  ;;  %v2939_v7 = vld [vmem:[#allocation3 + $0x54] sm:$0xf0]  ;;  %480 = vst [vmem:[#allocation3 + $0x7c] sm:$0xf] %v464_v22  ;;  %v2950_v48 = vld [vmem:[%s3786_s14 + $0x34] sm:$0xf] }
  0xb6   : > { %3016 = vmatpush.bf16.msra.mxu1 %v2724_v11  ;;  %v3913_v24 = vor.u32 %v2939_v7, %v2603_v6  ;;  %v2653_v49 = vld [vmem:[%s3786_s14 + $0x3c] sm:$0xf0]  ;;  %v2725_v51 = vld [vmem:[%s3786_s14 + $0xcc] sm:$0xf0]  ;;  %v2947_v56 = vld [vmem:[%s3786_s14 + $0x1c] sm:$0xf] }
  0xb7   : > { %v2611_v52 = vld [vmem:[#allocation3 + $0x60] sm:$0xf]  ;;  %v2940_v58 = vld [vmem:[#allocation3 + $0x64] sm:$0xf]  ;;  %v2943_v4 = vld [vmem:[#allocation3 + $0x74] sm:$0xf0] }
  0xb8   : > { %931 = vmatmul.bf16.vlgmr.msra.gmra.mxu3 %v3857_v16  ;;  %921 = vmatmul.bf16.vlgmr.msra.gmra.mxu0 %v3864_v20  ;;  %v2930_v41 = vld [vmem:[#allocation3 + $0x14] sm:$0xf] }
  0xb9   : > { %962 = vmatpush.bf16.msrb.mxu0 %v3810_v23  ;;  %980 = vmatmul.bf16.vlgmr.msra.gmra.mxu1 %v3859_v17  ;;  %v2589_v23 = vld [vmem:[#allocation3 + $0x38] sm:$0xf0]  ;;  %v2942_v5 = vld [vmem:[#allocation3 + $0x74] sm:$0xf] }
  0xba   : > { %1060 = vmatpush.bf16.msrb.mxu3 %v2812_v50  ;;  %v2968_v50 = vld [vmem:[%s3786_s14 + $0xc4] sm:$0xf] }
  0xbc   : > { %v2621_v6 = vld [vmem:[#allocation3 + $0x78] sm:$0xf0] }
  0xbd   : > { %963 = vmatpush.bf16.msrb.mxu0 %v3817_v29  ;;  %v3874_v29 = vor.u32 %v2934_v26, %v2589_v23  ;;  %v2977_v26 = vld [vmem:[%s3786_s14 + $0x10c] sm:$0xf]  ;;  %v2761_v23 = vld [vmem:[%s3786_s14 + $0x114] sm:$0xf0] }
  0xbe   : > { %1061 = vmatpush.bf16.msrb.mxu3 %v2800_v53  ;;  %v2764_v27 = vor.u32 %v2977_v26, %v2761_v23  ;;  %v2656_v53 = vor.u32 %v2950_v48, %v2653_v49 }
  0xc1   : > { %964 = vmatpush.bf16.msrb.mxu0 %v3824_v35  ;;  %v2937_v35 = vld [vmem:[#allocation3 + $0x44] sm:$0xf0] }
  0xc2   : > { %v3886_v46 = vor.u32 %v2937_v35, %v2595_v34  ;;  %1062 = vmatpush.bf16.msrb.mxu3 %v2788_v1  ;;  %v2680_v34 = vor.u32 %v2956_v28, %v2677_v31  ;;  %v2749_v35 = vld [vmem:[%s3786_s14 + $0xfc] sm:$0xf0]  ;;  %v2629_v1 = vld [vmem:[%s3786_s14 + $0xc] sm:$0xf0] }
  0xc3   : > { %v2752_v38 = vor.u32 %v2974_v32, %v2749_v35 }
  0xc5   : > { %965 = vmatpush.bf16.msrb.mxu0 %v3833_v43  ;;  %v446_v43 = vld [vmem:[%s3778_s9 + $0x68] sm:$0xff] }
  0xc6   : > { %v462_v45 = vpack.c.bf16 %v446_v43, %v446_v43  ;;  %1063 = vmatpush.bf16.msrb.mxu3 %v2776_v9  ;;  %v2668_v43 = vor.u32 %v2953_v36, %v2665_v37 }
  0xc8   : > { %936 = vmatmul.bf16.gmra.mxu3 %v3872_v30  ;;  %926 = vmatmul.bf16.gmra.mxu0 %v3879_v33  ;;  %478 = vst [vmem:[#allocation3 + $0x6c] sm:$0xf] %v462_v45  ;;  %v2740_v45 = vor.u32 %v2971_v39, %v2737_v40 }
  0xc9   : > { %966 = vmatpush.bf16.msrb.mxu0 %v3842_v55  ;;  %985 = vmatmul.bf16.gmra.mxu1 %v3874_v29  ;;  %v2713_v55 = vld [vmem:[%s3786_s14 + $0xb4] sm:$0xf0] }
  0xca   : > { %v2716_v57 = vor.u32 %v2965_v54, %v2713_v55  ;;  %1064 = vmatpush.bf16.msrb.mxu3 %v2764_v27  ;;  %v2941_v54 = vld [vmem:[#allocation3 + $0x64] sm:$0xf0]  ;;  %v2728_v55 = vor.u32 %v2968_v50, %v2725_v51 }
  0xcb   : > { %v3938_v60 = vor.u32 %v2941_v54, %v2611_v52  ;;  %v2967_v54 = vld [vmem:[%s3786_s14 + $0xb8] sm:$0xf0] }
  0xcc   : > { %3017 = vmatpush.bf16.msra.mxu2 %v2716_v57 }
  0xcd   : > { %967 = vmatpush.bf16.msrb.mxu0 %v2748_v61  ;;  %v2928_v61 = vld [vmem:[#allocation3 + $0x4] sm:$0xf] }
  0xce   : > { %v3902_v0 = vor.u32 %v2928_v61, %v2565_v62  ;;  %1065 = vmatpush.bf16.msrb.mxu3 %v2752_v38 }
  0xcf   : > { %v2613_v59 = vld [vmem:[#allocation3 + $0x68] sm:$0xf0] }
  0xd0   : > { %3018 = vmatpush.bf16.msra.mxu2 %v2704_v63  ;;  %v3940_v62 = vor.u32 %v2940_v58, %v2613_v59 }
  0xd1   : > { %968 = vmatpush.bf16.msrb.mxu0 %v2736_v3  ;;  %v2689_v3 = vld [vmem:[%s3786_s14 + $0x84] sm:$0xf0] }
  0xd2   : > { %v2692_v8 = vor.u32 %v2959_v2, %v2689_v3  ;;  %1066 = vmatpush.bf16.msrb.mxu3 %v2740_v45  ;;  %v2619_v3 = vld [vmem:[#allocation3 + $0x70] sm:$0xf] }
  0xd3   : > { %v3948_v7 = vor.u32 %v2943_v4, %v2619_v3  ;;  %v2803_v3 = vld [vmem:[%s3786_s14 + $0x158] sm:$0xf] }
  0xd4   : > { %3019 = vmatpush.bf16.msra.mxu2 %v2692_v8 }
  0xd5   : > { %969 = vmatpush.bf16.msrb.mxu0 %v2724_v11  ;;  %v436_v11 = vld [vmem:[%s3778_s9 + $0x18] sm:$0xff] }
  0xd6   : > { %v452_v18 = vpack.c.bf16 %v436_v11, %v436_v11  ;;  %1067 = vmatpush.bf16.msrb.mxu3 %v2728_v55  ;;  %v2815_v55 = vld [vmem:[%s3786_s14 + $0x170] sm:$0xf] }
  0xd8   : > { %941 = vmatmul.bf16.gmra.mxu3 %v3886_v46  ;;  %970 = vmatmul.bf16.vlgmr.msrb.gmra.mxu0 %v3902_v0  ;;  %468 = vst [vmem:[#allocation3 + $0x1c] sm:$0xf] %v452_v18 }
  0xd9   : > { %990 = vmatmul.bf16.gmra.mxu1 %v3888_v47  ;;  %1011 = vmatpush.bf16.msra.mxu0 %v2716_v57  ;;  %v2641_v57 = vld [vmem:[%s3786_s14 + $0x24] sm:$0xf0] }
  0xda   : > { %3020 = vmatpush.bf16.msra.mxu2 %v2680_v34  ;;  %v2644_v61 = vor.u32 %v2947_v56, %v2641_v57  ;;  %v2991_v57 = vld [vmem:[%s3786_s14 + $0x178] sm:$0xf0] }
  0xdb   : > { %v2816_v58 = vor.u32 %v2991_v57, %v2815_v55  ;;  %v2958_v55 = vld [vmem:[%s3786_s14 + $0x70] sm:$0xf0] }
  0xdd   : > { %1012 = vmatpush.bf16.msra.mxu0 %v2704_v63  ;;  %v2944_v63 = vld [vmem:[%s3786_s14 + $0x4] sm:$0xf]  ;;  %1158 = vmatpush.bf16.msrb.mxu1 %v2816_v58  ;;  %v2671_v58 = vld [vmem:[%s3786_s14 + $0x50] sm:$0xf] }
  0xde   : > { %3021 = vmatpush.bf16.msra.mxu2 %v2668_v43  ;;  %v2632_v2 = vor.u32 %v2944_v63, %v2629_v1  ;;  %v2707_v1 = vld [vmem:[%s3786_s14 + $0x98] sm:$0xf] }
  0xdf   : > { %v2573_v42 = vld [vmem:[#allocation3 + $0x18] sm:$0xf0] }
  0xe0   : > { %v3929_v44 = vor.u32 %v2930_v41, %v2573_v42 }
  0xe1   : > { %1013 = vmatpush.bf16.msra.mxu0 %v2692_v8  ;;  %v3950_v8 = vor.u32 %v2942_v5, %v2621_v6 }
  0xe2   : > { %3022 = vmatpush.bf16.msra.mxu2 %v2656_v53 }
  0xe5   : > { %1014 = vmatpush.bf16.msra.mxu0 %v2680_v34 }
  0xe6   : > { %3023 = vmatpush.bf16.msra.mxu2 %v2644_v61 }
  0xe8   : > { %946 = vmatmul.bf16.gmra.mxu3 %v3913_v24  ;;  %975 = vmatmul.bf16.gmra.mxu0 %v3929_v44 }
  0xe9   : > { %995 = vmatmul.bf16.gmra.mxu1 %v3915_v25  ;;  %1015 = vmatpush.bf16.msra.mxu0 %v2668_v43 }
  0xea   : > { %3024 = vmatpush.bf16.msra.mxu2 %v2632_v2 }
  0xed   : > { %1016 = vmatpush.bf16.msra.mxu0 %v2656_v53  ;;  %1029 = vmatmul.bf16.vlgmr.msra.gmra.mxu2 %v3857_v16  ;;  %v2719_v53 = vld [vmem:[%s3786_s14 + $0xb0] sm:$0xf] }
  0xee   : > { %v2720_v56 = vor.u32 %v2967_v54, %v2719_v53  ;;  %v2683_v54 = vld [vmem:[%s3786_s14 + $0x68] sm:$0xf] }
  0xf1   : > { %1017 = vmatpush.bf16.msra.mxu0 %v2644_v61 }
  0xf5   : > { %1018 = vmatpush.bf16.msra.mxu0 %v2632_v2  ;;  %v2964_v2 = vld [vmem:[%s3786_s14 + $0xa0] sm:$0xf0] }
  0xf6   : > { %v2708_v6 = vor.u32 %v2964_v2, %v2707_v1  ;;  %v2767_v1 = vld [vmem:[%s3786_s14 + $0x110] sm:$0xf] }
  0xf8   : > { %951 = vmatmul.bf16.gmra.mxu3 %v3938_v60  ;;  %1019 = vmatmul.bf16.vlgmr.msra.gmra.mxu0 %v3864_v20 }
  0xf9   : > { %1000 = vmatmul.bf16.gmra.mxu1 %v3940_v62  ;;  %1109 = vmatpush.bf16.msrb.mxu0 %v2720_v56  ;;  %v2779_v56 = vld [vmem:[%s3786_s14 + $0x128] sm:$0xf] }
  0xfd   : > { %1034 = vmatmul.bf16.gmra.mxu2 %v3872_v30  ;;  %1110 = vmatpush.bf16.msrb.mxu0 %v2708_v6  ;;  %v2659_v6 = vld [vmem:[%s3786_s14 + $0x38] sm:$0xf] }
 0x108   : > { %956 = vmatmul.bf16.gmra.mxu3 %v3948_v7  ;;  %1024 = vmatmul.bf16.gmra.mxu0 %v3879_v33 }
 0x109   : > { %1005 = vmatmul.bf16.gmra.mxu1 %v3950_v8 }
 0x10d   : > { %1039 = vmatmul.bf16.gmra.mxu2 %v3886_v46 }
 0x118   : > { %1068 = vmatmul.bf16.vlgmr.msrb.gmra.mxu3 %v3902_v0 }
 0x11d   : > { %1044 = vmatmul.bf16.gmra.mxu2 %v3913_v24 }
 0x128   : > { %1073 = vmatmul.bf16.gmra.mxu3 %v3929_v44 }
 0x12d   : > { %1049 = vmatmul.bf16.gmra.mxu2 %v3938_v60 }
 0x135   : > { %v3983_v37 = vpop.f32.mrf.mxu0 }
 0x136   : > { %v981_v9 = vpop.f32.mrf.mxu1 }
 0x138   : > { %1078 = vmatmul.bf16.gmra.mxu3 %v3859_v17 }
 0x13b   : > { %v932_v10 = vpop.f32.mrf.mxu3 }
 0x13c   : > { %v3961_v11 = vadd.f32 %v981_v9, %v932_v10  ;;  %v2988_v9 = vld [vmem:[%s3786_s14 + $0x160] sm:$0xf0] }
 0x13d   : > { %1054 = vmatmul.bf16.gmra.mxu2 %v3948_v7  ;;  %v3986_v40 = vpop.f32.mrf.mxu0  ;;  %v2804_v10 = vor.u32 %v2988_v9, %v2803_v3 }
 0x13e   : > { %v983_v12 = vpop.f32.mrf.mxu1 }
 0x13f   : > { %1159 = vmatpush.bf16.msrb.mxu1 %v2804_v10  ;;  %v2976_v10 = vld [vmem:[%s3786_s14 + $0x100] sm:$0xf0] }
 0x143   : > { %v934_v13 = vpop.f32.mrf.mxu3 }
 0x144   : > { %v3964_v14 = vadd.f32 %v983_v12, %v934_v13 }
 0x145   : > { %v3989_v43 = vpop.f32.mrf.mxu0 }
 0x146   : > { %v986_v15 = vpop.f32.mrf.mxu1  ;;  %v1213_v18 = vpack.c.bf16 %v3964_v14, %v3961_v11 }
 0x148   : > { %1083 = vmatmul.bf16.gmra.mxu3 %v3874_v29 }
 0x14b   : > { %v937_v19 = vpop.f32.mrf.mxu3 }
 0x14c   : > { %v3969_v21 = vadd.f32 %v986_v15, %v937_v19  ;;  %v2695_v15 = vld [vmem:[%s3786_s14 + $0x80] sm:$0xf]  ;;  %v2961_v19 = vld [vmem:[%s3786_s14 + $0x88] sm:$0xf0] }
 0x14d   : > { %v3991_v50 = vpop.f32.mrf.mxu0 }
 0x14e   : > { %v988_v22 = vpop.f32.mrf.mxu1 }
 0x153   : > { %v939_v26 = vpop.f32.mrf.mxu3 }
 0x154   : > { %v3972_v23 = vadd.f32 %v988_v22, %v939_v26  ;;  %v2791_v22 = vld [vmem:[%s3786_s14 + $0x140] sm:$0xf]  ;;  %v2696_v26 = vor.u32 %v2961_v19, %v2695_v15  ;;  %v2949_v15 = vld [vmem:[%s3786_s14 + $0x28] sm:$0xf0] }
 0x155   : > { %v3998_v59 = vpop.f32.mrf.mxu0  ;;  %v2743_v19 = vld [vmem:[%s3786_s14 + $0xe0] sm:$0xf] }
 0x156   : > { %v991_v27 = vpop.f32.mrf.mxu1  ;;  %v1216_v28 = vpack.c.bf16 %v3972_v23, %v3969_v21  ;;  %1111 = vmatpush.bf16.msrb.mxu0 %v2696_v26  ;;  %v2973_v26 = vld [vmem:[%s3786_s14 + $0xe8] sm:$0xf0] }
 0x158   : > { %1088 = vmatmul.bf16.gmra.mxu3 %v3888_v47 }
 0x15b   : > { %v942_v31 = vpop.f32.mrf.mxu3 }
 0x15c   : > { %v3977_v32 = vadd.f32 %v991_v27, %v942_v31  ;;  %v2985_v27 = vld [vmem:[%s3786_s14 + $0x148] sm:$0xf0] }
 0x15e   : > { %v3979_v34 = vpop.f32.mrf.mxu1 }
 0x163   : > { %v3981_v35 = vpop.f32.mrf.mxu3 }
 0x166   : > { %v996_v36 = vpop.f32.mrf.mxu1 }
 0x168   : > { %1093 = vmatmul.bf16.gmra.mxu3 %v3915_v25 }
 0x16b   : > { %v947_v38 = vpop.f32.mrf.mxu3 }
 0x16c   : > { %v997_v57 = vadd.f32 %v996_v36, %v947_v38 }
 0x16e   : > { %v998_v39 = vpop.f32.mrf.mxu1 }
 0x173   : > { %v949_v41 = vpop.f32.mrf.mxu3 }
 0x176   : > { %v1001_v42 = vpop.f32.mrf.mxu1 }
 0x178   : > { %1098 = vmatmul.bf16.gmra.mxu3 %v3940_v62 }
 0x17b   : > { %v952_v45 = vpop.f32.mrf.mxu3 }
 0x17c   : > { %v1002_v31 = vadd.f32 %v1001_v42, %v952_v45  ;;  %v2684_v42 = vor.u32 %v2958_v55, %v2683_v54  ;;  %v2982_v45 = vld [vmem:[%s3786_s14 + $0x130] sm:$0xf0] }
 0x17d   : > { %v2970_v55 = vld [vmem:[%s3786_s14 + $0xd0] sm:$0xf0] }
 0x17e   : > { %v1003_v48 = vpop.f32.mrf.mxu1  ;;  %1112 = vmatpush.bf16.msrb.mxu0 %v2684_v42 }
 0x183   : > { %v954_v49 = vpop.f32.mrf.mxu3 }
 0x184   : > { %v1004_v12 = vadd.f32 %v1003_v48, %v954_v49  ;;  %v999_v48 = vadd.f32 %v998_v39, %v949_v41  ;;  %v2979_v39 = vld [vmem:[%s3786_s14 + $0x118] sm:$0xf0]  ;;  %v994_v41 = vadd.f32 %v3979_v34, %v3981_v35  ;;  %v2952_v34 = vld [vmem:[%s3786_s14 + $0x40] sm:$0xf0]  ;;  %v2755_v35 = vld [vmem:[%s3786_s14 + $0xf8] sm:$0xf] }
 0x185   : > { %v2768_v36 = vor.u32 %v2979_v39, %v2767_v1  ;;  %v2660_v9 = vor.u32 %v2952_v34, %v2659_v6 }
 0x186   : > { %v1006_v51 = vpop.f32.mrf.mxu1  ;;  %v1225_v49 = vpack.c.bf16 %v1004_v12, %v1002_v31  ;;  %v1222_v2 = vpack.c.bf16 %v999_v48, %v997_v57  ;;  %v1219_v38 = vpack.c.bf16 %v994_v41, %v3977_v32  ;;  %v1030_v12 = vpop.f32.mrf.mxu2  ;;  %v2647_v32 = vld [vmem:[%s3786_s14 + $0x20] sm:$0xf]  ;;  %v2946_v48 = vld [vmem:[%s3786_s14 + $0x10] sm:$0xf0] }
 0x188   : > { %1103 = vmatmul.bf16.gmra.mxu3 %v3950_v8 }
 0x18b   : > { %v957_v52 = vpop.f32.mrf.mxu3 }
 0x18c   : > { %v1007_v4 = vadd.f32 %v1006_v51, %v957_v52  ;;  %v2792_v51 = vor.u32 %v2985_v27, %v2791_v22  ;;  %v4008_v52 = vpop.f32.mrf.mxu0  ;;  %v2648_v22 = vor.u32 %v2949_v15, %v2647_v32  ;;  %v2744_v27 = vor.u32 %v2973_v26, %v2743_v19 }
 0x18d   : > { %v974_v11 = vadd.f32 %v4008_v52, %v3986_v40 }
 0x18e   : > { %v1008_v61 = vpop.f32.mrf.mxu1  ;;  %1160 = vmatpush.bf16.msrb.mxu1 %v2792_v51  ;;  %v2635_v51 = vld [vmem:[%s3786_s14 + $0x8] sm:$0xf]  ;;  %v4047_v23 = vpop.f32.mrf.mxu2 }
 0x18f   : > { %v2636_v54 = vor.u32 %v2946_v48, %v2635_v51 }
 0x193   : > { %v959_v63 = vpop.f32.mrf.mxu3 }
 0x194   : > { %v1009_v5 = vadd.f32 %v1008_v61, %v959_v63  ;;  %v2955_v61 = vld [vmem:[%s3786_s14 + $0x58] sm:$0xf0]  ;;  %v2780_v63 = vor.u32 %v2982_v45, %v2779_v56 }
 0x195   : > { %v2672_v3 = vor.u32 %v2955_v61, %v2671_v58 }
 0x196   : > { %v1228_v13 = vpack.c.bf16 %v1009_v5, %v1007_v4  ;;  %1161 = vmatpush.bf16.msrb.mxu1 %v2780_v63  ;;  %v976_v4 = vpop.f32.mrf.mxu0 }
 0x197   : > { %1113 = vmatpush.bf16.msrb.mxu0 %v2672_v3  ;;  %v977_v42 = vadd.f32 %v976_v4, %v3989_v43 }
 0x198   : > { %1287 = vmatpush.bf16.msrb.mxu2 %v1228_v13  ;;  %v2756_v13 = vor.u32 %v2976_v10, %v2755_v35  ;;  %v4071_v35 = vld [vmem:[#allocation2] sm:$0xff] }
 0x19a   : > { %1162 = vmatpush.bf16.msrb.mxu1 %v2768_v36 }
 0x19b   : > { %v4010_v53 = vpop.f32.mrf.mxu3  ;;  %1114 = vmatpush.bf16.msrb.mxu0 %v2660_v9 }
 0x19c   : > { %1288 = vmatpush.bf16.msrb.mxu2 %v1225_v49  ;;  %v2731_v49 = vld [vmem:[%s3786_s14 + $0xc8] sm:$0xf]  ;;  %s3490_s14 = scalar_lea.hbm %s3489_s12, 128 }
 0x19d   : > { %v2732_v57 = vor.u32 %v2970_v55, %v2731_v49  ;;  %p3491_p6 = scmp.ne.s32.totalorder %s3489_s12, %s3490_s14  ;;  %p3496_p11 = scmp.lt.s32.totalorder %s3494_s8, %s3490_s14 }
 0x19e   : > { %1163 = vmatpush.bf16.msrb.mxu1 %v2756_v13  ;;  %v978_v56 = vpop.f32.mrf.mxu0 }
 0x19f   : > { %1115 = vmatpush.bf16.msrb.mxu0 %v2648_v22  ;;  %v979_v21 = vadd.f32 %v978_v56, %v3991_v50  ;;  %v1035_v50 = vpop.f32.mrf.mxu2  ;;  %v4076_v22 = vld [vmem:[#allocation2 + $0x8] sm:$0xff]  ;;  %p3492_p8 = pnand %p3491_p6, %p3709_p7  ;;  %p3497_p1 = por %p3496_p11, %p3495_p5 }
 0x1a0   : > { %1289 = vmatpush.bf16.msrb.mxu2 %v1222_v2 }
 0x1a1   : > { %v1210_v14 = vpack.c.bf16 %v979_v21, %v977_v42  ;;  %p3493_p13 = pneg %p3492_p8 }
 0x1a2   : > { %1164 = vmatpush.bf16.msrb.mxu1 %v2744_v27 }
 0x1a3   : > { %v4023_v5 = vpop.f32.mrf.mxu3  ;;  %1116 = vmatpush.bf16.msrb.mxu0 %v2636_v54  ;;  %p3498_p2 = pnand %p3497_p1, %p3493_p13 }
 0x1a4   : > { %1290 = vmatpush.bf16.msrb.mxu2 %v1219_v38 }
 0x1a6   : > { %1165 = vmatpush.bf16.msrb.mxu1 %v2732_v57  ;;  %1117 = vmatmul.bf16.vlgmr.msrb.gmra.mxu0 %v3864_v20  ;;  %v1020_v38 = vpop.f32.mrf.mxu0 }
 0x1a7   : > { %v1070_v57 = vadd.f32 %v4010_v53, %v1020_v38  ;;  %v4097_v53 = vld [vmem:[#allocation2 + $0x18] sm:$0xff] }
 0x1a8   : > { %1291 = vmatpush.bf16.msrb.mxu2 %v1216_v28  ;;  %v972_v28 = vadd.f32 %v3998_v59, %v3983_v37  ;;  %v1037_v37 = vpop.f32.mrf.mxu2 }
 0x1a9   : > { %1166 = vmatmul.bf16.vlgmr.msrb.gmra.mxu1 %v3902_v0 }
 0x1aa   : > { %v1207_v43 = vpack.c.bf16 %v974_v11, %v972_v28 }
 0x1ab   : > { %v4036_v31 = vpop.f32.mrf.mxu3 }
 0x1ac   : > { %1292 = vmatpush.bf16.msrb.mxu2 %v1213_v18 }
 0x1b0   : > { %1293 = vmatpush.bf16.msrb.mxu2 %v1210_v14  ;;  %v1040_v52 = vpop.f32.mrf.mxu2 }
 0x1b3   : > { %v4055_v18 = vpop.f32.mrf.mxu3 }
 0x1b4   : > { %1294 = vmatpush.bf16.msrb.mxu2 %v1207_v43 }
 0x1b6   : > { %1122 = vmatmul.bf16.gmra.mxu0 %v3879_v33 }
 0x1b7   : > { %1295 = vmatmul.bf16.vlgmr.msrb.gmra.mxu2 %v4071_v35 }
 0x1b8   : > { %v1042_v61 = vpop.f32.mrf.mxu2 }
 0x1b9   : > { %1171 = vmatmul.bf16.gmra.mxu1 %v3929_v44 }
 0x1bb   : > { %v1079_v45 = vpop.f32.mrf.mxu3 }
 0x1bc   : > { %v4057_v58 = vadd.f32 %v1079_v45, %v1030_v12 }
 0x1c0   : > { %v1045_v39 = vpop.f32.mrf.mxu2 }
 0x1c3   : > { %v1081_v20 = vpop.f32.mrf.mxu3 }
 0x1c4   : > { %v1082_v27 = vadd.f32 %v1081_v20, %v4047_v23  ;;  %v4087_v23 = vld [vmem:[#allocation2 + $0x10] sm:$0xff]  ;;  %v4107_v20 = vld [vmem:[#allocation2 + $0x20] sm:$0xff] }
 0x1c6   : > { %1127 = vmatmul.bf16.gmra.mxu0 %v3857_v16  ;;  %v1214_v49 = vpack.c.bf16 %v1082_v27, %v4057_v58  ;;  %v2997_v27 = vld [vmem:[%s3788_s23 + $0x28] sm:$0xff] }
 0x1c7   : > { %1300 = vmatmul.bf16.gmra.mxu2 %v4076_v22 }
 0x1c8   : > { %v1047_v44 = vpop.f32.mrf.mxu2 }
 0x1c9   : > { %1176 = vmatmul.bf16.gmra.mxu1 %v3859_v17 }
 0x1cb   : > { %v1084_v59 = vpop.f32.mrf.mxu3 }
 0x1cc   : > { %v1085_v40 = vadd.f32 %v1084_v59, %v1035_v50 }
 0x1d0   : > { %v1050_v16 = vpop.f32.mrf.mxu2 }
 0x1d3   : > { %v1086_v0 = vpop.f32.mrf.mxu3 }
 0x1d6   : > { %1132 = vmatmul.bf16.gmra.mxu0 %v3872_v30 }
 0x1d7   : > { %1305 = vmatmul.bf16.gmra.mxu2 %v4087_v23 }
 0x1d8   : > { %v1052_v17 = vpop.f32.mrf.mxu2 }
 0x1d9   : > { %1181 = vmatmul.bf16.gmra.mxu1 %v3874_v29  ;;  %v1022_v29 = vpop.f32.mrf.mxu0 }
 0x1da   : > { %v1072_v54 = vadd.f32 %v4023_v5, %v1022_v29 }
 0x1db   : > { %v1089_v63 = vpop.f32.mrf.mxu3 }
 0x1dc   : > { %v1090_v1 = vadd.f32 %v1089_v63, %v1040_v52  ;;  %v1208_v21 = vpack.c.bf16 %v1072_v54, %v1070_v57 }
 0x1e0   : > { %v1055_v30 = vpop.f32.mrf.mxu2 }
 0x1e1   : > { %v1025_v13 = vpop.f32.mrf.mxu0 }
 0x1e3   : > { %v1091_v33 = vpop.f32.mrf.mxu3 }
 0x1e6   : > { %1137 = vmatmul.bf16.gmra.mxu0 %v3886_v46 }
 0x1e7   : > { %1310 = vmatmul.bf16.gmra.mxu2 %v4097_v53 }
 0x1e8   : > { %v1057_v46 = vpop.f32.mrf.mxu2 }
 0x1e9   : > { %1186 = vmatmul.bf16.gmra.mxu1 %v3888_v47  ;;  %v1027_v26 = vpop.f32.mrf.mxu0 }
 0x1ea   : > { %v1077_v48 = vadd.f32 %v4055_v18, %v1027_v26 }
 0x1eb   : > { %v1094_v41 = vpop.f32.mrf.mxu3 }
 0x1ec   : > { %v1095_v32 = vadd.f32 %v1094_v41, %v1045_v39  ;;  %v4119_v41 = vld [vmem:[#allocation2 + $0x30] sm:$0xff] }
 0x1f3   : > { %v1096_v2 = vpop.f32.mrf.mxu3 }
 0x1f6   : > { %1142 = vmatmul.bf16.gmra.mxu0 %v3913_v24 }
 0x1f7   : > { %1315 = vmatmul.bf16.gmra.mxu2 %v4107_v20 }
 0x1f9   : > { %1191 = vmatmul.bf16.gmra.mxu1 %v3915_v25  ;;  %v1097_v25 = vadd.f32 %v1096_v2, %v1047_v44 }
 0x1fb   : > { %v1099_v3 = vpop.f32.mrf.mxu3  ;;  %v1223_v15 = vpack.c.bf16 %v1097_v25, %v1095_v32 }
 0x1fc   : > { %v1100_v24 = vadd.f32 %v1099_v3, %v1050_v16 }
 0x203   : > { %v1101_v36 = vpop.f32.mrf.mxu3 }
 0x204   : > { %v1102_v9 = vadd.f32 %v1101_v36, %v1052_v17  ;;  %v4123_v36 = vld [vmem:[#allocation2 + $0x38] sm:$0xff] }
 0x206   : > { %1147 = vmatmul.bf16.gmra.mxu0 %v3938_v60  ;;  %v1226_v12 = vpack.c.bf16 %v1102_v9, %v1100_v24  ;;  %v1092_v60 = vadd.f32 %v1091_v33, %v1042_v61  ;;  %v4115_v61 = vld [vmem:[#allocation2 + $0x28] sm:$0xff]  ;;  %v2999_v9 = vld [vmem:[%s3788_s23 + $0x38] sm:$0xff] }
 0x207   : > { %1320 = vmatmul.bf16.gmra.mxu2 %v4115_v61  ;;  %2130 = vmatpush.bf16.msra.mxu1 %v2999_v9 }
 0x208   : > { %v1220_v19 = vpack.c.bf16 %v1092_v60, %v1090_v1  ;;  %v2998_v60 = vld [vmem:[%s3788_s23 + $0x30] sm:$0xff] }
 0x209   : > { %1196 = vmatmul.bf16.gmra.mxu1 %v3940_v62  ;;  %v1087_v62 = vadd.f32 %v1086_v0, %v1037_v37 }
 0x20b   : > { %v1104_v4 = vpop.f32.mrf.mxu3  ;;  %v1217_v51 = vpack.c.bf16 %v1087_v62, %v1085_v40  ;;  %2131 = vmatpush.bf16.msra.mxu1 %v2998_v60 }
 0x20c   : > { %v1105_v47 = vadd.f32 %v1104_v4, %v1055_v30 }
 0x20f   : > { %2132 = vmatpush.bf16.msra.mxu1 %v2997_v27 }
 0x213   : > { %v1106_v6 = vpop.f32.mrf.mxu3 }
 0x214   : > { %v1107_v34 = vadd.f32 %v1106_v6, %v1057_v46 }
 0x216   : > { %v1229_v10 = vpack.c.bf16 %v1107_v34, %v1105_v47  ;;  %1152 = vmatmul.bf16.gmra.mxu0 %v3948_v7  ;;  %v1075_v7 = vadd.f32 %v4036_v31, %v1025_v13 }
 0x217   : > { %1325 = vmatmul.bf16.gmra.mxu2 %v4119_v41 }
 0x218   : > { %1336 = vmatpush.bf16.msra.mxu3 %v1229_v10 }
 0x219   : > { %1201 = vmatmul.bf16.gmra.mxu1 %v3950_v8  ;;  %v1211_v8 = vpack.c.bf16 %v1077_v48, %v1075_v7 }
 0x21c   : > { %1337 = vmatpush.bf16.msra.mxu3 %v1226_v12 }
 0x220   : > { %1338 = vmatpush.bf16.msra.mxu3 %v1223_v15 }
 0x223   : > { %v1118_v55 = vpop.f32.mrf.mxu0 }
 0x224   : > { %1339 = vmatpush.bf16.msra.mxu3 %v1220_v19 }
 0x226   : > { %v1167_v56 = vpop.f32.mrf.mxu1 }
 0x227   : > { %v4085_v42 = vadd.f32 %v1167_v56, %v1118_v55  ;;  %1330 = vmatmul.bf16.gmra.mxu2 %v4123_v36  ;;  %v2995_v55 = vld [vmem:[%s3788_s23 + $0x18] sm:$0xff] }
 0x228   : > { %1340 = vmatpush.bf16.msra.mxu3 %v1217_v51 }
 0x22b   : > { %v4089_v28 = vpop.f32.mrf.mxu0 }
 0x22c   : > { %1341 = vmatpush.bf16.msra.mxu3 %v1214_v49  ;;  %v2996_v49 = vld [vmem:[%s3788_s23 + $0x20] sm:$0xff] }
 0x22d   : > { %2133 = vmatpush.bf16.msra.mxu1 %v2996_v49 }
 0x22e   : > { %v4093_v31 = vpop.f32.mrf.mxu1 }
 0x230   : > { %1342 = vmatpush.bf16.msra.mxu3 %v1211_v8  ;;  %v4134_v8 = vld [vmem:[%s3795_s20] sm:$0x7] }
 0x231   : > { %2134 = vmatpush.bf16.msra.mxu1 %v2995_v55  ;;  %v4138_v56 = vperm.slane %v4134_v8, 1 }
 0x233   : > { %v1123_v5 = vpop.f32.mrf.mxu0 }
 0x234   : > { %1343 = vmatpush.bf16.msra.mxu3 %v1208_v21 }
 0x236   : > { %v1172_v11 = vpop.f32.mrf.mxu1 }
 0x237   : > { %1344 = vmatmul.bf16.vlgmr.msra.gmra.mxu3 %v4071_v35  ;;  %v4095_v14 = vadd.f32 %v1172_v11, %v1123_v5  ;;  %v2994_v5 = vld [vmem:[%s3788_s23 + $0x10] sm:$0xff] }
 0x238   : > { %2135 = vmatpush.bf16.msra.mxu1 %v2994_v5 }
 0x23b   : > { %v4099_v18 = vpop.f32.mrf.mxu0 }
 0x23e   : > { %v4103_v43 = vpop.f32.mrf.mxu1 }
 0x243   : > { %v1128_v50 = vpop.f32.mrf.mxu0 }
 0x246   : > { %v1177_v45 = vpop.f32.mrf.mxu1 }
 0x247   : > { %1349 = vmatmul.bf16.gmra.mxu3 %v4076_v22  ;;  %v4105_v58 = vadd.f32 %v1177_v45, %v1128_v50  ;;  %v1175_v45 = vadd.f32 %v4103_v43, %v4099_v18 }
 0x24b   : > { %v4109_v37 = vpop.f32.mrf.mxu0 }
 0x24e   : > { %v1179_v59 = vpop.f32.mrf.mxu1 }
 0x24f   : > { %v1180_v57 = vadd.f32 %v1179_v59, %v4109_v37  ;;  %v1170_v37 = vadd.f32 %v4093_v31, %v4089_v28  ;;  %v1212_v59 = vpack.c.bf16 %v1175_v45, %v4095_v14 }
 0x251   : > { %v1209_v18 = vpack.c.bf16 %v1170_v37, %v4085_v42 }
 0x253   : > { %v1133_v40 = vpop.f32.mrf.mxu0 }
 0x256   : > { %v1182_v52 = vpop.f32.mrf.mxu1 }
 0x257   : > { %1354 = vmatmul.bf16.gmra.mxu3 %v4087_v23  ;;  %v4113_v0 = vadd.f32 %v1182_v52, %v1133_v40  ;;  %v1215_v40 = vpack.c.bf16 %v1180_v57, %v4105_v58  ;;  %v2993_v52 = vld [vmem:[%s3788_s23 + $0x8] sm:$0xff] }
 0x258   : > { %2136 = vmatpush.bf16.msra.mxu1 %v2993_v52 }
 0x25b   : > { %v1135_v63 = vpop.f32.mrf.mxu0 }
 0x25e   : > { %v1184_v1 = vpop.f32.mrf.mxu1 }
 0x25f   : > { %v1185_v7 = vadd.f32 %v1184_v1, %v1135_v63 }
 0x261   : > { %v1218_v21 = vpack.c.bf16 %v1185_v7, %v4113_v0  ;;  %v2992_v0 = vld [vmem:[%s3788_s23] sm:$0xff] }
 0x262   : > { %2137 = vmatpush.bf16.msra.mxu1 %v2992_v0 }
 0x263   : > { %v1138_v39 = vpop.f32.mrf.mxu0 }
 0x266   : > { %v1187_v33 = vpop.f32.mrf.mxu1 }
 0x267   : > { %1359 = vmatmul.bf16.gmra.mxu3 %v4097_v53  ;;  %v1188_v44 = vadd.f32 %v1187_v33, %v1138_v39 }
 0x26b   : > { %v1140_v2 = vpop.f32.mrf.mxu0 }
 0x26e   : > { %v1189_v16 = vpop.f32.mrf.mxu1 }
 0x26f   : > { %v1190_v51 = vadd.f32 %v1189_v16, %v1140_v2 }
 0x271   : > { %v1221_v54 = vpack.c.bf16 %v1190_v51, %v1188_v44 }
 0x273   : > { %v1143_v3 = vpop.f32.mrf.mxu0 }
 0x276   : > { %v1192_v17 = vpop.f32.mrf.mxu1 }
 0x277   : > { %1364 = vmatmul.bf16.gmra.mxu3 %v4107_v20  ;;  %v1193_v62 = vadd.f32 %v1192_v17, %v1143_v3 }
 0x27b   : > { %v1145_v38 = vpop.f32.mrf.mxu0 }
 0x27e   : > { %v1194_v30 = vpop.f32.mrf.mxu1 }
 0x27f   : > { %v1195_v19 = vadd.f32 %v1194_v30, %v1145_v38 }
 0x281   : > { %v1224_v48 = vpack.c.bf16 %v1195_v19, %v1193_v62 }
 0x283   : > { %v1148_v4 = vpop.f32.mrf.mxu0 }
 0x286   : > { %v1197_v29 = vpop.f32.mrf.mxu1 }
 0x287   : > { %1369 = vmatmul.bf16.gmra.mxu3 %v4115_v61  ;;  %v1198_v12 = vadd.f32 %v1197_v29, %v1148_v4 }
 0x28b   : > { %v1150_v46 = vpop.f32.mrf.mxu0 }
 0x28e   : > { %v1199_v6 = vpop.f32.mrf.mxu1 }
 0x28f   : > { %v1200_v13 = vadd.f32 %v1199_v6, %v1150_v46 }
 0x291   : > { %v1227_v26 = vpack.c.bf16 %v1200_v13, %v1198_v12 }
 0x293   : > { %v1153_v47 = vpop.f32.mrf.mxu0 }
 0x296   : > { %v1202_v34 = vpop.f32.mrf.mxu1 }
 0x297   : > { %1374 = vmatmul.bf16.gmra.mxu3 %v4119_v41  ;;  %v1203_v24 = vadd.f32 %v1202_v34, %v1153_v47 }
 0x29b   : > { %v1155_v10 = vpop.f32.mrf.mxu0 }
 0x29e   : > { %v1204_v25 = vpop.f32.mrf.mxu1 }
 0x29f   : > { %v1205_v32 = vadd.f32 %v1204_v25, %v1155_v10 }
 0x2a1   : > { %v1230_v15 = vpack.c.bf16 %v1205_v32, %v1203_v24  ;;  %v4198_v24 = vld [vmem:[%s3778_s9 + $0x18] sm:$0xff] }
 0x2a3   : > { %1385 = vmatpush.bf16.msra.mxu0 %v1230_v15 }
 0x2a7   : > { %1379 = vmatmul.bf16.gmra.mxu3 %v4123_v36  ;;  %1386 = vmatpush.bf16.msra.mxu0 %v1227_v26 }
 0x2ab   : > { %1387 = vmatpush.bf16.msra.mxu0 %v1224_v48 }
 0x2af   : > { %1388 = vmatpush.bf16.msra.mxu0 %v1221_v54 }
 0x2b3   : > { %1389 = vmatpush.bf16.msra.mxu0 %v1218_v21  ;;  %v4170_v21 = vld [vmem:[%s3778_s9] sm:$0xff] }
 0x2b7   : > { %1390 = vmatpush.bf16.msra.mxu0 %v1215_v40 }
 0x2ba   : > { %v1345_v11 = vpop.f32.mrf.mxu3 }
 0x2bb   : > { %v1346_v50 = vadd.f32 %v1345_v11, %v4138_v56  ;;  %1391 = vmatpush.bf16.msra.mxu0 %v1212_v59  ;;  %v4174_v11 = vld [vmem:[%s3778_s9 + $0x8] sm:$0xff] }
 0x2bd   : > { %v2865_v63 = vmul.f32 -1.442695, %v1346_v50 }
 0x2bf   : > { %3112 = vpow2.f32 %v2865_v63  ;;  %1392 = vmatpush.bf16.msra.mxu0 %v1209_v18 }
 0x2c2   : > { %v1347_v1 = vpop.f32.mrf.mxu3  ;;  %1393 = vmatmul.bf16.vlgmr.msra.gmra.mxu0 %v4071_v35 }
 0x2c3   : > { %v1348_v39 = vadd.f32 %v1347_v1, %v4138_v56 }
 0x2c5   : > { %v3113_v43 = vpop.eup %3112  ;;  %v2866_v58 = vmul.f32 -1.442695, %v1348_v39 }
 0x2c6   : > { %v1786_v33 = vadd.f32 1.0, %v3113_v43 }
 0x2c7   : > { %3114 = vpow2.f32 %v2866_v58 }
 0x2c8   : > { %3116 = vrcp.f32 %v1786_v33  ;;  %v1813_v34 = vand.u32 2147483648, %v1786_v33  ;;  %vm1807_vm1 = vweird.f32 %v1786_v33  ;;  %v1811_v9 = vand.u32 2147483647, %v1786_v33 }
 0x2ca   : > { %v1350_v44 = vpop.f32.mrf.mxu3  ;;  %v1814_v62 = vor.u32 1.1754944e-38, %v1813_v34  ;;  %vm1812_vm4 = vcmp.eq.f32.partialorder %v1811_v9, 8.507059e+37  ;;  %v4194_v9 = vld [vmem:[%s3778_s9 + $0x10] sm:$0xff] }
 0x2cb   : > { %v1351_v28 = vadd.f32 %v1350_v44, %v4138_v56 }
 0x2cd   : > { %v3115_v31 = vpop.eup %3114  ;;  %v2867_v14 = vmul.f32 -1.442695, %v1351_v28 }
 0x2ce   : > { %v3117_v2 = vpop.eup %3116  ;;  %v1787_v16 = vadd.f32 1.0, %v3115_v31 }
 0x2cf   : > { %v1803_v3 = vmul.f32 %v3117_v2, %v1786_v33  ;;  %3118 = vpow2.f32 %v2867_v14  ;;  %vm1808_vm0 = vweird.f32 %v3117_v2 }
 0x2d0   : > { %3120 = vrcp.f32 %v1787_v16  ;;  %vm4160_vm2 = vmor %vm1807_vm1, %vm1808_vm0  ;;  %v1826_v25 = vand.u32 2147483647, %v1787_v16  ;;  %v1828_v12 = vand.u32 2147483648, %v1787_v16  ;;  %vm1822_vm5 = vweird.f32 %v1787_v16 }
 0x2d1   : > { %v1804_v42 = vsub.f32 1.0, %v1803_v3 }
 0x2d2   : > { %v1352_v17 = vpop.f32.mrf.mxu3  ;;  %1398 = vmatmul.bf16.gmra.mxu0 %v4076_v22  ;;  %v1829_v48 = vor.u32 1.1754944e-38, %v1828_v12  ;;  %vm1827_vm7 = vcmp.eq.f32.partialorder %v1826_v25, 8.507059e+37 }
 0x2d3   : > { %v1805_v38 = vmul.f32 %v3117_v2, %v1804_v42  ;;  %v1353_v30 = vadd.f32 %v1352_v17, %v4138_v56 }
 0x2d5   : > { %v3119_v4 = vpop.eup %3118  ;;  %v2868_v29 = vmul.f32 -1.442695, %v1353_v30  ;;  %v1806_v47 = vadd.f32 %v3117_v2, %v1805_v38 }
 0x2d6   : > { %v3121_v46 = vpop.eup %3120  ;;  %v4157_v6 = vadd.f32 1.0, %v3119_v4 }
 0x2d7   : > { %v1818_v35 = vmul.f32 %v3121_v46, %v1787_v16  ;;  %3122 = vpow2.f32 %v2868_v29  ;;  %vm1823_vm3 = vweird.f32 %v3121_v46  ;;  %v1810_v15 = vsel %vm4160_vm2, %v3117_v2, %v1806_v47 }
 0x2d8   : > { %3124 = vrcp.f32 %v4157_v6  ;;  %vm1824_vm6 = vmor %vm1822_vm5, %vm1823_vm3  ;;  %v1815_v7 = vsel %vm1812_vm4, %v1814_v62, %v1810_v15  ;;  %v1843_v43 = vand.u32 2147483648, %v4157_v6  ;;  %vm1837_vm9 = vweird.f32 %v4157_v6 }
 0x2d9   : > { %v1819_v10 = vsub.f32 1.0, %v1818_v35  ;;  %v2042_v5 = vmul.f32 %v4170_v21, %v1815_v7  ;;  %v1841_v33 = vand.u32 2147483647, %v4157_v6 }
 0x2da   : > { %v1355_v13 = vpop.f32.mrf.mxu3  ;;  %v1844_v42 = vor.u32 1.1754944e-38, %v1843_v43 }
 0x2db   : > { %v1820_v32 = vmul.f32 %v3121_v46, %v1819_v10  ;;  %v1356_v60 = vadd.f32 %v1355_v13, %v4138_v56  ;;  %vm1842_vm12 = vcmp.eq.f32.partialorder %v1841_v33, 8.507059e+37 }
 0x2dd   : > { %v3123_v19 = vpop.eup %3122  ;;  %v1821_v26 = vadd.f32 %v3121_v46, %v1820_v32  ;;  %v2869_v27 = vmul.f32 -1.442695, %v1356_v60 }
 0x2de   : > { %v3125_v51 = vpop.eup %3124  ;;  %v1789_v49 = vadd.f32 1.0, %v3123_v19 }
 0x2df   : > { %v1833_v54 = vmul.f32 %v3125_v51, %v4157_v6  ;;  %3126 = vpow2.f32 %v2869_v27  ;;  %v1825_v55 = vsel %vm1824_vm6, %v3121_v46, %v1821_v26  ;;  %vm1838_vm8 = vweird.f32 %v3125_v51 }
 0x2e0   : > { %3128 = vrcp.f32 %v1789_v49  ;;  %v1830_v22 = vsel %vm1827_vm7, %v1829_v48, %v1825_v55  ;;  %vm4184_vm10 = vmor %vm1837_vm9, %vm1838_vm8  ;;  %v1856_v31 = vand.u32 2147483647, %v1789_v49  ;;  %v1858_v14 = vand.u32 2147483648, %v1789_v49 }
 0x2e1   : > { %v1834_v57 = vsub.f32 1.0, %v1833_v54  ;;  %v2043_v50 = vmul.f32 %v4174_v11, %v1830_v22  ;;  %vm1852_vm13 = vweird.f32 %v1789_v49 }
 0x2e2   : > { %v1357_v45 = vpop.f32.mrf.mxu3  ;;  %1403 = vmatmul.bf16.gmra.mxu0 %v4087_v23  ;;  %v1859_v6 = vor.u32 1.1754944e-38, %v1858_v14  ;;  %vm1857_vm15 = vcmp.eq.f32.partialorder %v1856_v31, 8.507059e+37  ;;  %v4222_v31 = vld [vmem:[%s3778_s9 + $0x28] sm:$0xff] }
 0x2e3   : > { %v1358_v40 = vadd.f32 %v1357_v45, %v4138_v56  ;;  %v2058_v52 = vpack.c.bf16 %v2043_v50, %v2042_v5  ;;  %v1835_v63 = vmul.f32 %v3125_v51, %v1834_v57 }
 0x2e5   : > { %v3127_v37 = vpop.eup %3126  ;;  %v2870_v59 = vmul.f32 -1.442695, %v1358_v40  ;;  %2138 = vmatmul.bf16.vlgmr.msra.gmra.mxu1 %v2058_v52  ;;  %v1836_v18 = vadd.f32 %v3125_v51, %v1835_v63 }
 0x2e6   : > { %v3129_v0 = vpop.eup %3128  ;;  %v4178_v1 = vadd.f32 1.0, %v3127_v37 }
 0x2e7   : > { %v1848_v39 = vmul.f32 %v3129_v0, %v1789_v49  ;;  %3130 = vpow2.f32 %v2870_v59  ;;  %v1840_v16 = vsel %vm4184_vm10, %v3125_v51, %v1836_v18  ;;  %vm1853_vm11 = vweird.f32 %v3129_v0 }
 0x2e8   : > { %3132 = vrcp.f32 %v4178_v1  ;;  %v1845_v46 = vsel %vm1842_vm12, %v1844_v42, %v1840_v16  ;;  %vm1854_vm14 = vmor %vm1852_vm13, %vm1853_vm11  ;;  %v1873_v48 = vand.u32 2147483648, %v4178_v1  ;;  %vm1867_vm1 = vweird.f32 %v4178_v1 }
 0x2e9   : > { %v1849_v58 = vsub.f32 1.0, %v1848_v39  ;;  %v2044_v10 = vmul.f32 %v4194_v9, %v1845_v46  ;;  %v1871_v7 = vand.u32 2147483647, %v4178_v1 }
 0x2ea   : > { %v1360_v44 = vpop.f32.mrf.mxu3  ;;  %v1874_v40 = vor.u32 1.1754944e-38, %v1873_v48 }
 0x2eb   : > { %v1361_v2 = vadd.f32 %v1360_v44, %v4138_v56  ;;  %v1850_v3 = vmul.f32 %v3129_v0, %v1849_v58  ;;  %vm1872_vm4 = vcmp.eq.f32.partialorder %v1871_v7, 8.507059e+37  ;;  %v4218_v44 = vld [vmem:[%s3778_s9 + $0x20] sm:$0xff] }
 0x2ed   : > { %v3131_v17 = vpop.eup %3130  ;;  %v2871_v38 = vmul.f32 -1.442695, %v1361_v2  ;;  %v1851_v30 = vadd.f32 %v3129_v0, %v1850_v3 }
 0x2ee   : > { %v3133_v4 = vpop.eup %3132  ;;  %v1791_v29 = vadd.f32 1.0, %v3131_v17 }
 0x2ef   : > { %v1863_v47 = vmul.f32 %v3133_v4, %v4178_v1  ;;  %3134 = vpow2.f32 %v2871_v38  ;;  %v1855_v35 = vsel %vm1854_vm14, %v3129_v0, %v1851_v30  ;;  %vm1868_vm0 = vweird.f32 %v3133_v4 }
 0x2f0   : > { %3136 = vrcp.f32 %v1791_v29  ;;  %v1860_v23 = vsel %vm1857_vm15, %v1859_v6, %v1855_v35  ;;  %vm4208_vm2 = vmor %vm1867_vm1, %vm1868_vm0  ;;  %v1886_v22 = vand.u32 2147483647, %v1791_v29  ;;  %v1888_v57 = vand.u32 2147483648, %v1791_v29 }
 0x2f1   : > { %v1864_v34 = vsub.f32 1.0, %v1863_v47  ;;  %v2045_v25 = vmul.f32 %v4198_v24, %v1860_v23  ;;  %vm1882_vm5 = vweird.f32 %v1791_v29 }
 0x2f2   : > { %v1362_v12 = vpop.f32.mrf.mxu3  ;;  %1408 = vmatmul.bf16.gmra.mxu0 %v4097_v53  ;;  %v1889_v39 = vor.u32 1.1754944e-38, %v1888_v57  ;;  %vm1887_vm7 = vcmp.eq.f32.partialorder %v1886_v22, 8.507059e+37  ;;  %v4242_v22 = vld [vmem:[%s3778_s9 + $0x30] sm:$0xff] }
 0x2f3   : > { %v1363_v13 = vadd.f32 %v1362_v12, %v4138_v56  ;;  %v2059_v32 = vpack.c.bf16 %v2045_v25, %v2044_v10  ;;  %v1865_v60 = vmul.f32 %v3133_v4, %v1864_v34 }
 0x2f5   : > { %v3135_v15 = vpop.eup %3134  ;;  %v2872_v62 = vmul.f32 -1.442695, %v1363_v13  ;;  %2143 = vmatmul.bf16.gmra.mxu1 %v2059_v32  ;;  %v1866_v51 = vadd.f32 %v3133_v4, %v1865_v60 }
 0x2f6   : > { %v3137_v19 = vpop.eup %3136  ;;  %v4202_v26 = vadd.f32 1.0, %v3135_v15 }
 0x2f7   : > { %v1878_v27 = vmul.f32 %v3137_v19, %v1791_v29  ;;  %3138 = vpow2.f32 %v2872_v62  ;;  %v1870_v50 = vsel %vm4208_vm2, %v3133_v4, %v1866_v51  ;;  %vm1883_vm3 = vweird.f32 %v3137_v19 }
 0x2f8   : > { %3140 = vrcp.f32 %v4202_v26  ;;  %v1875_v1 = vsel %vm1872_vm4, %v1874_v40, %v1870_v50  ;;  %vm1884_vm6 = vmor %vm1882_vm5, %vm1883_vm3  ;;  %v1903_v6 = vand.u32 2147483648, %v4202_v26  ;;  %vm1897_vm9 = vweird.f32 %v4202_v26 }
 0x2f9   : > { %v1879_v49 = vsub.f32 1.0, %v1878_v27  ;;  %v2046_v28 = vmul.f32 %v4218_v44, %v1875_v1  ;;  %v1901_v35 = vand.u32 2147483647, %v4202_v26 }
 0x2fa   : > { %v1365_v54 = vpop.f32.mrf.mxu3  ;;  %v1904_v60 = vor.u32 1.1754944e-38, %v1903_v6 }
 0x2fb   : > { %v1366_v5 = vadd.f32 %v1365_v54, %v4138_v56  ;;  %v1880_v45 = vmul.f32 %v3137_v19, %v1879_v49  ;;  %vm1902_vm12 = vcmp.eq.f32.partialorder %v1901_v35, 8.507059e+37 }
 0x2fd   : > { %v3139_v52 = vpop.eup %3138  ;;  %v2873_v63 = vmul.f32 -1.442695, %v1366_v5  ;;  %v1881_v37 = vadd.f32 %v3137_v19, %v1880_v45  ;;  %v3279_v5 = vld [vmem:[%s3778_s9 + $0x38] sm:$0xff] }
 0x2fe   : > { %v3141_v59 = vpop.eup %3140  ;;  %v1793_v0 = vadd.f32 1.0, %v3139_v52 }
 0x2ff   : > { %v1893_v18 = vmul.f32 %v3141_v59, %v4202_v26  ;;  %3142 = vpow2.f32 %v2873_v63  ;;  %v1885_v43 = vsel %vm1884_vm6, %v3137_v19, %v1881_v37  ;;  %vm1898_vm8 = vweird.f32 %v3141_v59 }
 0x300   : > { %3144 = vrcp.f32 %v1793_v0  ;;  %v1890_v58 = vsel %vm1887_vm7, %v1889_v39, %v1885_v43  ;;  %vm4232_vm10 = vmor %vm1897_vm9, %vm1898_vm8  ;;  %v1916_v10 = vand.u32 2147483647, %v1793_v0  ;;  %v1918_v25 = vand.u32 2147483648, %v1793_v0 }
 0x301   : > { %v1894_v33 = vsub.f32 1.0, %v1893_v18  ;;  %v2047_v14 = vmul.f32 %v4222_v31, %v1890_v58  ;;  %vm1912_vm13 = vweird.f32 %v1793_v0 }
 0x302   : > { %v1367_v2 = vpop.f32.mrf.mxu3  ;;  %1413 = vmatmul.bf16.gmra.mxu0 %v4107_v20  ;;  %v1919_v48 = vor.u32 1.1754944e-38, %v1918_v25  ;;  %vm1917_vm15 = vcmp.eq.f32.partialorder %v1916_v10, 8.507059e+37 }
 0x303   : > { %v1368_v16 = vadd.f32 %v1367_v2, %v4138_v56  ;;  %v2060_v3 = vpack.c.bf16 %v2047_v14, %v2046_v28  ;;  %v1895_v42 = vmul.f32 %v3141_v59, %v1894_v33 }
 0x305   : > { %v3143_v17 = vpop.eup %3142  ;;  %v2874_v38 = vmul.f32 -1.442695, %v1368_v16  ;;  %2148 = vmatmul.bf16.gmra.mxu1 %v2060_v3  ;;  %v1896_v46 = vadd.f32 %v3141_v59, %v1895_v42 }
 0x306   : > { %v3145_v30 = vpop.eup %3144  ;;  %v4226_v4 = vadd.f32 1.0, %v3143_v17 }
 0x307   : > { %v1908_v29 = vmul.f32 %v3145_v30, %v1793_v0  ;;  %3146 = vpow2.f32 %v2874_v38  ;;  %v1900_v13 = vsel %vm4232_vm10, %v3141_v59, %v1896_v46  ;;  %vm1913_vm11 = vweird.f32 %v3145_v30 }
 0x308   : > { %3148 = vrcp.f32 %v4226_v4  ;;  %v1905_v51 = vsel %vm1902_vm12, %v1904_v60, %v1900_v13  ;;  %vm1914_vm14 = vmor %vm1912_vm13, %vm1913_vm11  ;;  %v1933_v43 = vand.u32 2147483648, %v4226_v4  ;;  %vm1927_vm1 = vweird.f32 %v4226_v4 }
 0x309   : > { %v1909_v47 = vsub.f32 1.0, %v1908_v29  ;;  %v2048_v57 = vmul.f32 %v4242_v22, %v1905_v51  ;;  %v1931_v33 = vand.u32 2147483647, %v4226_v4 }
 0x30a   : > { %v1370_v23 = vpop.f32.mrf.mxu3  ;;  %v1934_v38 = vor.u32 1.1754944e-38, %v1933_v43 }
 0x30b   : > { %v1371_v12 = vadd.f32 %v1370_v23, %v4138_v56  ;;  %v1910_v32 = vmul.f32 %v3145_v30, %v1909_v47  ;;  %vm1932_vm4 = vcmp.eq.f32.partialorder %v1931_v33, 8.507059e+37 }
 0x30d   : > { %v3147_v15 = vpop.eup %3146  ;;  %v2875_v62 = vmul.f32 -1.442695, %v1371_v12  ;;  %v1911_v19 = vadd.f32 %v3145_v30, %v1910_v32  ;;  %v3280_v12 = vld [vmem:[%s3778_s9 + $0x40] sm:$0xff]  ;;  %v3281_v32 = vld [vmem:[%s3778_s9 + $0x48] sm:$0xff] }
 0x30e   : > { %v3149_v26 = vpop.eup %3148  ;;  %v1795_v27 = vadd.f32 1.0, %v3147_v15 }
 0x30f   : > { %v1923_v49 = vmul.f32 %v3149_v26, %v4226_v4  ;;  %3150 = vpow2.f32 %v2875_v62  ;;  %v1915_v7 = vsel %vm1914_vm14, %v3145_v30, %v1911_v19  ;;  %vm1928_vm0 = vweird.f32 %v3149_v26 }
 0x310   : > { %3152 = vrcp.f32 %v1795_v27  ;;  %v1920_v54 = vsel %vm1917_vm15, %v1919_v48, %v1915_v7  ;;  %vm4253_vm2 = vmor %vm1927_vm1, %vm1928_vm0  ;;  %v1946_v2 = vand.u32 2147483647, %v1795_v27  ;;  %v1948_v16 = vand.u32 2147483648, %v1795_v27 }
 0x311   : > { %v1924_v55 = vsub.f32 1.0, %v1923_v49  ;;  %v2049_v50 = vmul.f32 %v3279_v5, %v1920_v54  ;;  %vm1942_vm5 = vweird.f32 %v1795_v27 }
 0x312   : > { %v1372_v45 = vpop.f32.mrf.mxu3  ;;  %1418 = vmatmul.bf16.gmra.mxu0 %v4115_v61  ;;  %v1949_v35 = vor.u32 1.1754944e-38, %v1948_v16  ;;  %vm1947_vm7 = vcmp.eq.f32.partialorder %v1946_v2, 8.507059e+37 }
 0x313   : > { %v1373_v40 = vadd.f32 %v1372_v45, %v4138_v56  ;;  %v2061_v52 = vpack.c.bf16 %v2049_v50, %v2048_v57  ;;  %v1925_v63 = vmul.f32 %v3149_v26, %v1924_v55 }
 0x315   : > { %v3151_v37 = vpop.eup %3150  ;;  %v2876_v59 = vmul.f32 -1.442695, %v1373_v40  ;;  %2153 = vmatmul.bf16.gmra.mxu1 %v2061_v52  ;;  %v1926_v18 = vadd.f32 %v3149_v26, %v1925_v63 }
 0x316   : > { %v3153_v0 = vpop.eup %3152  ;;  %v4247_v1 = vadd.f32 1.0, %v3151_v37 }
 0x317   : > { %v1938_v39 = vmul.f32 %v3153_v0, %v1795_v27  ;;  %3154 = vpow2.f32 %v2876_v59  ;;  %v1930_v42 = vsel %vm4253_vm2, %v3149_v26, %v1926_v18  ;;  %vm1943_vm3 = vweird.f32 %v3153_v0 }
 0x318   : > { %3156 = vrcp.f32 %v4247_v1  ;;  %v1935_v47 = vsel %vm1932_vm4, %v1934_v38, %v1930_v42  ;;  %vm1944_vm6 = vmor %vm1942_vm5, %vm1943_vm3  ;;  %v1963_v55 = vand.u32 2147483648, %v4247_v1  ;;  %vm1957_vm9 = vweird.f32 %v4247_v1  ;;  %v3282_v42 = vld [vmem:[%s3778_s9 + $0x50] sm:$0xff]  ;;  %v3283_v38 = vld [vmem:[%s3778_s9 + $0x58] sm:$0xff] }
 0x319   : > { %v1939_v58 = vsub.f32 1.0, %v1938_v39  ;;  %v2050_v13 = vmul.f32 %v3280_v12, %v1935_v47  ;;  %v1961_v5 = vand.u32 2147483647, %v4247_v1 }
 0x31a   : > { %v1375_v28 = vpop.f32.mrf.mxu3 }
 0x31b   : > { %v1376_v3 = vadd.f32 %v1375_v28, %v4138_v56  ;;  %v1940_v17 = vmul.f32 %v3153_v0, %v1939_v58  ;;  %vm1962_vm12 = vcmp.eq.f32.partialorder %v1961_v5, 8.507059e+37 }
 0x31d   : > { %v3155_v30 = vpop.eup %3154  ;;  %v2877_v29 = vmul.f32 -1.442695, %v1376_v3  ;;  %v1941_v4 = vadd.f32 %v3153_v0, %v1940_v17 }
 0x31e   : > { %v3157_v46 = vpop.eup %3156  ;;  %v1797_v6 = vadd.f32 1.0, %v3155_v30 }
 0x31f   : > { %v1953_v23 = vmul.f32 %v3157_v46, %v4247_v1  ;;  %3158 = vpow2.f32 %v2877_v29  ;;  %v1945_v34 = vsel %vm1944_vm6, %v3153_v0, %v1941_v4  ;;  %vm1958_vm8 = vweird.f32 %v3157_v46 }
 0x320   : > { %3160 = vrcp.f32 %v1797_v6  ;;  %v1950_v10 = vsel %vm1947_vm7, %v1949_v35, %v1945_v34  ;;  %vm4271_vm10 = vmor %vm1957_vm9, %vm1958_vm8  ;;  %v1976_v40 = vand.u32 2147483647, %v1797_v6  ;;  %v1978_v52 = vand.u32 2147483648, %v1797_v6 }
 0x321   : > { %v1954_v25 = vsub.f32 1.0, %v1953_v23  ;;  %v2051_v60 = vmul.f32 %v3281_v32, %v1950_v10  ;;  %v1964_v0 = vor.u32 1.1754944e-38, %v1963_v55  ;;  %vm1972_vm13 = vweird.f32 %v1797_v6 }
 0x322   : > { %v1377_v15 = vpop.f32.mrf.mxu3  ;;  %1423 = vmatmul.bf16.gmra.mxu0 %v4119_v41  ;;  %v1979_v28 = vor.u32 1.1754944e-38, %v1978_v52  ;;  %vm1977_vm15 = vcmp.eq.f32.partialorder %v1976_v40, 8.507059e+37  ;;  %v3285_v40 = vld [vmem:[%s3778_s9 + $0x68] sm:$0xff] }
 0x323   : > { %v1378_v62 = vadd.f32 %v1377_v15, %v4138_v56  ;;  %v2062_v19 = vpack.c.bf16 %v2051_v60, %v2050_v13  ;;  %v1955_v26 = vmul.f32 %v3157_v46, %v1954_v25 }
 0x325   : > { %v3159_v27 = vpop.eup %3158  ;;  %v2878_v51 = vmul.f32 -1.442695, %v1378_v62  ;;  %2158 = vmatmul.bf16.gmra.mxu1 %v2062_v19  ;;  %v1956_v54 = vadd.f32 %v3157_v46, %v1955_v26 }
 0x326   : > { %v3161_v48 = vpop.eup %3160  ;;  %v4265_v49 = vadd.f32 1.0, %v3159_v27 }
 0x327   : > { %v1968_v7 = vmul.f32 %v3161_v48, %v1797_v6  ;;  %3162 = vpow2.f32 %v2878_v51  ;;  %v1960_v37 = vsel %vm4271_vm10, %v3157_v46, %v1956_v54  ;;  %vm1973_vm11 = vweird.f32 %v3161_v48 }
 0x328   : > { %3164 = vrcp.f32 %v4265_v49  ;;  %v1965_v33 = vsel %vm1962_vm12, %v1964_v0, %v1960_v37  ;;  %vm1974_vm14 = vmor %vm1972_vm13, %vm1973_vm11  ;;  %v1993_v12 = vand.u32 2147483648, %v4265_v49  ;;  %vm1987_vm1 = vweird.f32 %v4265_v49 }
 0x329   : > { %v1969_v57 = vsub.f32 1.0, %v1968_v7  ;;  %v2052_v17 = vmul.f32 %v3282_v42, %v1965_v33  ;;  %v1991_v32 = vand.u32 2147483647, %v4265_v49 }
 0x32a   : > { %v1380_v50 = vpop.f32.mrf.mxu3  ;;  %v1994_v19 = vor.u32 1.1754944e-38, %v1993_v12 }
 0x32b   : > { %v1381_v63 = vadd.f32 %v1380_v50, %v4138_v56  ;;  %v1970_v59 = vmul.f32 %v3161_v48, %v1969_v57  ;;  %vm1992_vm4 = vcmp.eq.f32.partialorder %v1991_v32, 8.507059e+37  ;;  %v3284_v50 = vld [vmem:[%s3778_s9 + $0x60] sm:$0xff] }
 0x32d   : > { %v3163_v39 = vpop.eup %3162  ;;  %v2879_v18 = vmul.f32 -1.442695, %v1381_v63  ;;  %v1971_v1 = vadd.f32 %v3161_v48, %v1970_v59 }
 0x32e   : > { %v3165_v43 = vpop.eup %3164  ;;  %v1799_v58 = vadd.f32 1.0, %v3163_v39 }
 0x32f   : > { %v1983_v14 = vmul.f32 %v3165_v43, %v4265_v49  ;;  %3166 = vpow2.f32 %v2879_v18  ;;  %v1975_v2 = vsel %vm1974_vm14, %v3161_v48, %v1971_v1  ;;  %vm1988_vm0 = vweird.f32 %v3165_v43 }
 0x330   : > { %3168 = vrcp.f32 %v1799_v58  ;;  %v1980_v16 = vsel %vm1977_vm15, %v1979_v28, %v1975_v2  ;;  %vm1989_vm2 = vmor %vm1987_vm1, %vm1988_vm0  ;;  %v2006_v62 = vand.u32 2147483647, %v1799_v58  ;;  %vm2002_vm5 = vweird.f32 %v1799_v58 }
 0x331   : > { %v1984_v3 = vsub.f32 1.0, %v1983_v14  ;;  %v2053_v30 = vmul.f32 %v3283_v38, %v1980_v16 }
 0x332   : > { %v1382_v29 = vpop.f32.mrf.mxu3  ;;  %1428 = vmatmul.bf16.gmra.mxu0 %v4123_v36  ;;  %vm2007_vm7 = vcmp.eq.f32.partialorder %v2006_v62, 8.507059e+37 }
 0x333   : > { %v1383_v4 = vadd.f32 %v1382_v29, %v4138_v56  ;;  %v2063_v46 = vpack.c.bf16 %v2053_v30, %v2052_v17  ;;  %v1985_v6 = vmul.f32 %v3165_v43, %v1984_v3  ;;  %v2008_v56 = vand.u32 2147483648, %v1799_v58  ;;  %v3286_v30 = vld [vmem:[%s3778_s9 + $0x70] sm:$0xff] }
 0x335   : > { %v3167_v47 = vpop.eup %3166  ;;  %v2880_v35 = vmul.f32 -1.442695, %v1383_v4  ;;  %2163 = vmatmul.bf16.gmra.mxu1 %v2063_v46  ;;  %v1986_v25 = vadd.f32 %v3165_v43, %v1985_v6  ;;  %v2009_v49 = vor.u32 1.1754944e-38, %v2008_v56  ;;  %v3287_v4 = vld [vmem:[%s3778_s9 + $0x78] sm:$0xff] }
 0x336   : > { %v3169_v23 = vpop.eup %3168  ;;  %v1800_v34 = vadd.f32 1.0, %v3167_v47 }
 0x337   : > { %v1998_v10 = vmul.f32 %v3169_v23, %v1799_v58  ;;  %3170 = vpow2.f32 %v2880_v35  ;;  %v1990_v60 = vsel %vm1989_vm2, %v3165_v43, %v1986_v25  ;;  %vm2003_vm3 = vweird.f32 %v3169_v23 }
 0x338   : > { %3172 = vrcp.f32 %v1800_v34  ;;  %v1995_v7 = vsel %vm1992_vm4, %v1994_v19, %v1990_v60  ;;  %vm2004_vm6 = vmor %vm2002_vm5, %vm2003_vm3  ;;  %v2023_v18 = vand.u32 2147483648, %v1800_v34  ;;  %vm2017_vm9 = vweird.f32 %v1800_v34 }
 0x339   : > { %v1999_v13 = vsub.f32 1.0, %v1998_v10  ;;  %v2054_v45 = vmul.f32 %v3284_v50, %v1995_v7  ;;  %v2021_v43 = vand.u32 2147483647, %v1800_v34 }
 0x33a   : > { %v2024_v2 = vor.u32 1.1754944e-38, %v2023_v18 }
 0x33b   : > { %v2000_v15 = vmul.f32 %v3169_v23, %v1999_v13  ;;  %vm2022_vm12 = vcmp.eq.f32.partialorder %v2021_v43, 8.507059e+37 }
 0x33d   : > { %v3171_v26 = vpop.eup %3170  ;;  %v2001_v27 = vadd.f32 %v3169_v23, %v2000_v15 }
 0x33e   : > { %v3173_v51 = vpop.eup %3172  ;;  %v1801_v48 = vadd.f32 1.0, %v3171_v26 }
 0x33f   : > { %v2013_v54 = vmul.f32 %v3173_v51, %v1800_v34  ;;  %v2005_v55 = vsel %vm2004_vm6, %v3169_v23, %v2001_v27  ;;  %vm2018_vm8 = vweird.f32 %v3173_v51 }
 0x340   : > { %3174 = vrcp.f32 %v1801_v48  ;;  %v2010_v57 = vsel %vm2007_vm7, %v2009_v49, %v2005_v55  ;;  %vm2019_vm10 = vmor %vm2017_vm9, %vm2018_vm8  ;;  %v2038_v58 = vand.u32 2147483648, %v1801_v48  ;;  %v2036_v14 = vand.u32 2147483647, %v1801_v48 }
 0x341   : > { %v2014_v5 = vsub.f32 1.0, %v2013_v54  ;;  %v2055_v52 = vmul.f32 %v3285_v40, %v2010_v57  ;;  %vm2032_vm13 = vweird.f32 %v1801_v48  ;;  %v1296_v57 = vpop.f32.mrf.mxu2 }
 0x342   : > { %v2039_v42 = vor.u32 1.1754944e-38, %v2038_v58  ;;  %vm2037_vm15 = vcmp.eq.f32.partialorder %v2036_v14, 8.507059e+37 }
 0x343   : > { %v2064_v63 = vpack.c.bf16 %v2055_v52, %v2054_v45  ;;  %v2015_v37 = vmul.f32 %v3173_v51, %v2014_v5  ;;  %v3288_v52 = vld [vmem:[#allocation2] sm:$0xff] }
 0x345   : > { %2168 = vmatmul.bf16.gmra.mxu1 %v2064_v63  ;;  %v2016_v39 = vadd.f32 %v3173_v51, %v2015_v37 }
 0x346   : > { %v3175_v59 = vpop.eup %3174 }
 0x347   : > { %v2028_v0 = vmul.f32 %v3175_v59, %v1801_v48  ;;  %v2020_v33 = vsel %vm2019_vm10, %v3173_v51, %v2016_v39  ;;  %vm2033_vm11 = vweird.f32 %v3175_v59  ;;  %v3290_v39 = vld [vmem:[#allocation2 + $0x10] sm:$0xff] }
 0x348   : > { %v2025_v3 = vsel %vm2022_vm12, %v2024_v2, %v2020_v33  ;;  %vm2034_vm14 = vmor %vm2032_vm13, %vm2033_vm11 }
 0x349   : > { %v2029_v1 = vsub.f32 1.0, %v2028_v0  ;;  %v2056_v29 = vmul.f32 %v3286_v30, %v2025_v3  ;;  %v1298_v45 = vpop.f32.mrf.mxu2 }
 0x34b   : > { %v2030_v28 = vmul.f32 %v3175_v59, %v2029_v1 }
 0x34d   : > { %v2031_v16 = vadd.f32 %v3175_v59, %v2030_v28  ;;  %v4305_v28 = vperm.slane %v4134_v8, 0 }
 0x34f   : > { %v2035_v17 = vsel %vm2034_vm14, %v3175_v59, %v2031_v16  ;;  %v3289_v59 = vld [vmem:[#allocation2 + $0x8] sm:$0xff]  ;;  %v1297_v2 = vadd.f32 %v1296_v57, %v4305_v28 }
 0x350   : > { %v2040_v38 = vsel %vm2037_vm15, %v2039_v42, %v2035_v17 }
 0x351   : > { %v2057_v46 = vmul.f32 %v3287_v4, %v2040_v38  ;;  %v1301_v40 = vpop.f32.mrf.mxu2  ;;  %v2849_v16 = vmul.f32 -1.442695, %v1297_v2 }
 0x353   : > { %v2065_v6 = vpack.c.bf16 %v2057_v46, %v2056_v29  ;;  %3176 = vpow2.f32 %v2849_v16 }
 0x355   : > { %2173 = vmatmul.bf16.gmra.mxu1 %v2065_v6 }
 0x359   : > { %v1303_v63 = vpop.f32.mrf.mxu2  ;;  %v3177_v17 = vpop.eup %3176 }
 0x35a   : > { %v1482_v38 = vadd.f32 1.0, %v3177_v17 }
 0x35c   : > { %vm1503_vm0 = vweird.f32 %v1482_v38  ;;  %v1507_v57 = vand.u32 2147483647, %v1482_v38 }
 0x35e   : > { %vm1508_vm5 = vcmp.eq.f32.partialorder %v1507_v57, 8.507059e+37 }
 0x361   : > { %v1306_v37 = vpop.f32.mrf.mxu2 }
 0x362   : > { %v2139_v47 = vpop.f32.mrf.mxu1 }
 0x369   : > { %v1308_v0 = vpop.f32.mrf.mxu2 }
 0x36a   : > { %v2141_v35 = vpop.f32.mrf.mxu1 }
 0x36b   : > { %v2179_v23 = vpack.c.bf16 %v2141_v35, %v2139_v47  ;;  %v1304_v47 = vadd.f32 %v1303_v63, %v4305_v28 }
 0x36d   : > { %v2852_v35 = vmul.f32 -1.442695, %v1304_v47 }
 0x371   : > { %v4291_v18 = vpop.f32.mrf.mxu2 }
 0x372   : > { %v2144_v34 = vpop.f32.mrf.mxu1 }
 0x379   : > { %v4293_v1 = vpop.f32.mrf.mxu2 }
 0x37a   : > { %v2146_v10 = vpop.f32.mrf.mxu1 }
 0x37b   : > { %v2180_v25 = vpack.c.bf16 %v2146_v10, %v2144_v34 }
 0x381   : > { %v4296_v43 = vpop.f32.mrf.mxu2 }
 0x382   : > { %v2149_v12 = vpop.f32.mrf.mxu1 }
 0x389   : > { %v4298_v58 = vpop.f32.mrf.mxu2 }
 0x38a   : > { %v2151_v13 = vpop.f32.mrf.mxu1 }
 0x38b   : > { %v2181_v32 = vpack.c.bf16 %v2151_v13, %v2149_v12  ;;  %v1307_v12 = vadd.f32 %v1306_v37, %v4305_v28 }
 0x391   : > { %v4301_v33 = vpop.f32.mrf.mxu2 }
 0x392   : > { %v2154_v56 = vpop.f32.mrf.mxu1 }
 0x399   : > { %v4307_v14 = vpop.f32.mrf.mxu2 }
 0x39a   : > { %v2156_v60 = vpop.f32.mrf.mxu1 }
 0x39b   : > { %v2182_v15 = vpack.c.bf16 %v2156_v60, %v2154_v56  ;;  %v2853_v60 = vmul.f32 -1.442695, %v1307_v12 }
 0x3a1   : > { %v4311_v3 = vpop.f32.mrf.mxu2 }
 0x3a2   : > { %v2159_v62 = vpop.f32.mrf.mxu1 }
 0x3a9   : > { %v4315_v30 = vpop.f32.mrf.mxu2 }
 0x3aa   : > { %v2161_v19 = vpop.f32.mrf.mxu1 }
 0x3ab   : > { %v2183_v50 = vpack.c.bf16 %v2161_v19, %v2159_v62 }
 0x3b2   : > { %v2164_v26 = vpop.f32.mrf.mxu1 }
 0x3ba   : > { %v2166_v27 = vpop.f32.mrf.mxu1 }
 0x3bb   : > { %v2184_v5 = vpack.c.bf16 %v2166_v27, %v2164_v26  ;;  %v4337_v26 = vperm.slane %v4134_v8, 2  ;;  %v1309_v27 = vadd.f32 %v1308_v0, %v4305_v28 }
 0x3c2   : > { %v2169_v51 = vpop.f32.mrf.mxu1 }
 0x3ca   : > { %v2171_v48 = vpop.f32.mrf.mxu1 }
 0x3cb   : > { %v2185_v55 = vpack.c.bf16 %v2171_v48, %v2169_v51 }
 0x3d2   : > { %v2174_v7 = vpop.f32.mrf.mxu1 }
 0x3da   : > { %v2176_v49 = vpop.f32.mrf.mxu1 }
 0x3db   : > { %v2186_v54 = vpack.c.bf16 %v2176_v49, %v2174_v7  ;;  %v1509_v7 = vand.u32 2147483648, %v1482_v38 }
 0x3dd   : > { %2187 = vmatpush.bf16.msra.mxu2 %v2186_v54 }
 0x3e1   : > { %2188 = vmatpush.bf16.msra.mxu2 %v2185_v55 }
 0x3e5   : > { %2189 = vmatpush.bf16.msra.mxu2 %v2184_v5 }
 0x3e9   : > { %2190 = vmatpush.bf16.msra.mxu2 %v2183_v50  ;;  %v2854_v50 = vmul.f32 -1.442695, %v1309_v27 }
 0x3ed   : > { %2191 = vmatpush.bf16.msra.mxu2 %v2182_v15 }
 0x3f1   : > { %2192 = vmatpush.bf16.msra.mxu2 %v2181_v32 }
 0x3f5   : > { %2193 = vmatpush.bf16.msra.mxu2 %v2180_v25 }
 0x3f9   : > { %2194 = vmatpush.bf16.msra.mxu2 %v2179_v23  ;;  %v4322_v23 = vpop.f32.mrf.mxu2 }
 0x3fc   : > { %2195 = vmatmul.bf16.vlgmr.msra.gmra.mxu2 %v3288_v52 }
 0x401   : > { %v4334_v62 = vpop.f32.mrf.mxu2 }
 0x40c   : > { %2200 = vmatmul.bf16.gmra.mxu2 %v3289_v59 }
 0x41c   : > { %2205 = vmatmul.bf16.gmra.mxu2 %v3290_v39 }
 0x42c   : > { %2210 = vmatmul.bf16.gmra.mxu2 %v4097_v53  ;;  %v1299_v53 = vadd.f32 %v1298_v45, %v4305_v28 }
 0x42e   : > { %v2850_v42 = vmul.f32 -1.442695, %v1299_v53  ;;  %v1312_v53 = vadd.f32 %v4291_v18, %v4305_v28 }
 0x430   : > { %3178 = vpow2.f32 %v2850_v42 }
 0x431   : > { %3180 = vrcp.f32 %v1482_v38 }
 0x436   : > { %v3179_v29 = vpop.eup %3178 }
 0x437   : > { %v4317_v6 = vadd.f32 1.0, %v3179_v29 }
 0x439   : > { %vm1518_vm3 = vweird.f32 %v4317_v6  ;;  %v1524_v2 = vand.u32 2147483648, %v4317_v6  ;;  %v1522_v17 = vand.u32 2147483647, %v4317_v6 }
 0x43b   : > { %v1525_v18 = vor.u32 1.1754944e-38, %v1524_v2  ;;  %vm1523_vm7 = vcmp.eq.f32.partialorder %v1522_v17, 8.507059e+37  ;;  %v1317_v2 = vadd.f32 %v4296_v43, %v4305_v28 }
 0x43c   : > { %2215 = vmatmul.bf16.gmra.mxu2 %v4107_v20  ;;  %v1394_v20 = vpop.f32.mrf.mxu0 }
 0x43d   : > { %v1395_v54 = vadd.f32 %v1394_v20, %v4337_v26  ;;  %v2857_v43 = vmul.f32 -1.442695, %v1317_v2 }
 0x444   : > { %v1396_v46 = vpop.f32.mrf.mxu0 }
 0x445   : > { %v1397_v47 = vadd.f32 %v1396_v46, %v4337_v26  ;;  %v1314_v46 = vadd.f32 %v4293_v1, %v4305_v28 }
 0x44c   : > { %2220 = vmatmul.bf16.gmra.mxu2 %v4115_v61  ;;  %v1302_v61 = vadd.f32 %v1301_v40, %v4305_v28  ;;  %v4324_v25 = vpop.f32.mrf.mxu0  ;;  %v1510_v40 = vor.u32 1.1754944e-38, %v1509_v7 }
 0x44e   : > { %v2851_v4 = vmul.f32 -1.442695, %v1302_v61 }
 0x450   : > { %3182 = vpow2.f32 %v2851_v4 }
 0x451   : > { %3184 = vrcp.f32 %v4317_v6 }
 0x452   : > { %3186 = vpow2.f32 %v2852_v35 }
 0x454   : > { %v4342_v49 = vpop.f32.mrf.mxu0 }
 0x45c   : > { %2225 = vmatmul.bf16.gmra.mxu2 %v4119_v41  ;;  %v3181_v41 = vpop.eup %3180  ;;  %v4372_v29 = vpop.f32.mrf.mxu0 }
 0x45d   : > { %v3183_v34 = vpop.eup %3182  ;;  %v1499_v10 = vmul.f32 %v3181_v41, %v1482_v38  ;;  %vm1504_vm1 = vweird.f32 %v3181_v41 }
 0x45e   : > { %v4327_v13 = vpop.eup %3184  ;;  %v4329_v32 = vadd.f32 1.0, %v3183_v34  ;;  %vm4347_vm2 = vmor %vm1503_vm0, %vm1504_vm1 }
 0x45f   : > { %v1500_v56 = vsub.f32 1.0, %v1499_v10  ;;  %v3187_v15 = vpop.eup %3186  ;;  %vm1519_vm4 = vweird.f32 %v4327_v13 }
 0x460   : > { %3188 = vrcp.f32 %v4329_v32  ;;  %v4340_v48 = vadd.f32 1.0, %v3187_v15  ;;  %vm4365_vm6 = vmor %vm1518_vm3, %vm1519_vm4  ;;  %vm1533_vm8 = vweird.f32 %v4329_v32  ;;  %v1539_v15 = vand.u32 2147483648, %v4329_v32 }
 0x461   : > { %v1501_v19 = vmul.f32 %v3181_v41, %v1500_v56  ;;  %3190 = vpow2.f32 %v2853_v60  ;;  %v1537_v8 = vand.u32 2147483647, %v4329_v32 }
 0x462   : > { %3192 = vrcp.f32 %v4340_v48  ;;  %vm1548_vm11 = vweird.f32 %v4340_v48  ;;  %v1554_v17 = vand.u32 2147483648, %v4340_v48 }
 0x463   : > { %v1502_v55 = vadd.f32 %v3181_v41, %v1501_v19  ;;  %3194 = vpow2.f32 %v2854_v50  ;;  %vm1538_vm13 = vcmp.eq.f32.partialorder %v1537_v8, 8.507059e+37 }
 0x465   : > { %v1506_v59 = vsel %vm4347_vm2, %v3181_v41, %v1502_v55 }
 0x466   : > { %v4345_v5 = vpop.eup %3188  ;;  %v1511_v42 = vsel %vm1508_vm5, %v1510_v40, %v1506_v59 }
 0x467   : > { %v3191_v63 = vpop.eup %3190  ;;  %v1529_v37 = vmul.f32 %v4345_v5, %v4329_v32  ;;  %v2284_v4 = vsub.f32 1.0, %v1511_v42  ;;  %vm1534_vm9 = vweird.f32 %v4345_v5 }
 0x468   : > { %v4361_v16 = vadd.f32 1.0, %v3191_v63  ;;  %v4370_v61 = vpop.eup %3192  ;;  %vm4398_vm10 = vmor %vm1533_vm8, %vm1534_vm9 }
 0x469   : > { %v1530_v38 = vsub.f32 1.0, %v1529_v37  ;;  %v3195_v35 = vpop.eup %3194  ;;  %v1544_v34 = vmul.f32 %v4370_v61, %v4340_v48  ;;  %v4407_v37 = vpop.f32.mrf.mxu0  ;;  %vm1549_vm12 = vweird.f32 %v4370_v61 }
 0x46a   : > { %vm4423_vm14 = vmor %vm1548_vm11, %vm1549_vm12  ;;  %vm1563_vm0 = vweird.f32 %v4361_v16 }
 0x46b   : > { %v1531_v56 = vmul.f32 %v4345_v5, %v1530_v38  ;;  %v1545_v27 = vsub.f32 1.0, %v1544_v34  ;;  %v1402_v34 = vadd.f32 %v4342_v49, %v4337_v26 }
 0x46c   : > { %2230 = vmatmul.bf16.gmra.mxu2 %v4123_v36  ;;  %v1514_v36 = vmul.f32 %v4327_v13, %v4317_v6  ;;  %v2855_v6 = vmul.f32 -1.442695, %v1312_v53 }
 0x46d   : > { %v1532_v55 = vadd.f32 %v4345_v5, %v1531_v56 }
 0x46e   : > { %v1515_v51 = vsub.f32 1.0, %v1514_v36 }
 0x470   : > { %v1516_v45 = vmul.f32 %v4327_v13, %v1515_v51  ;;  %v4388_v51 = vadd.f32 1.0, %v3195_v35  ;;  %v1552_v35 = vand.u32 2147483647, %v4340_v48 }
 0x472   : > { %v1517_v39 = vadd.f32 %v4327_v13, %v1516_v45  ;;  %vm1553_vm15 = vcmp.eq.f32.partialorder %v1552_v35, 8.507059e+37  ;;  %vm1578_vm4 = vweird.f32 %v4388_v51  ;;  %v1582_v35 = vand.u32 2147483647, %v4388_v51 }
 0x474   : > { %v1521_v41 = vsel %vm4365_vm6, %v4327_v13, %v1517_v39  ;;  %v2268_v13 = vmul.f32 %v4170_v21, %v1511_v42  ;;  %v2856_v21 = vmul.f32 -1.442695, %v1314_v46 }
 0x475   : > { %v1526_v19 = vsel %vm1523_vm7, %v1525_v18, %v1521_v41  ;;  %vm1583_vm7 = vcmp.eq.f32.partialorder %v1582_v35, 8.507059e+37 }
 0x476   : > { %v2269_v45 = vmul.f32 %v4174_v11, %v1526_v19  ;;  %v2285_v40 = vsub.f32 1.0, %v1526_v19  ;;  %v1536_v11 = vsel %vm4398_vm10, %v4345_v5, %v1532_v55  ;;  %v4443_v19 = vpop.f32.mrf.mxu0 }
 0x47f   : > { %v2196_v52 = vpop.f32.mrf.mxu2 }
 0x480   : > { %v2236_v0 = vadd.f32 %v2196_v52, %v1395_v54  ;;  %v1400_v54 = vadd.f32 %v4324_v25, %v4337_v26  ;;  %v1546_v25 = vmul.f32 %v4370_v61, %v1545_v27  ;;  %v1540_v52 = vor.u32 1.1754944e-38, %v1539_v15 }
 0x482   : > { %3196 = vtanh.f32 %v2236_v0  ;;  %v1547_v20 = vadd.f32 %v4370_v61, %v1546_v25  ;;  %v1541_v5 = vsel %vm1538_vm13, %v1540_v52, %v1536_v11 }
 0x483   : > { %3198 = vrcp.f32 %v4361_v16 }
 0x484   : > { %v1551_v56 = vsel %vm4423_vm14, %v4370_v61, %v1547_v20  ;;  %v1569_v61 = vand.u32 2147483648, %v4361_v16 }
 0x487   : > { %v2198_v10 = vpop.f32.mrf.mxu2 }
 0x488   : > { %v3197_v12 = vpop.eup %3196  ;;  %v2237_v36 = vadd.f32 %v2198_v10, %v1397_v47  ;;  %v2270_v10 = vmul.f32 %v4194_v9, %v1541_v5  ;;  %v1319_v9 = vadd.f32 %v4298_v58, %v4305_v28 }
 0x489   : > { %v2300_v60 = vmul.f32 %v3197_v12, %v2284_v4  ;;  %v4393_v1 = vpop.eup %3198  ;;  %v2286_v12 = vsub.f32 1.0, %v1541_v5 }
 0x48a   : > { %3200 = vtanh.f32 %v2237_v36  ;;  %v1559_v0 = vmul.f32 %v4393_v1, %v4361_v16  ;;  %v1555_v36 = vor.u32 1.1754944e-38, %v1554_v17  ;;  %vm1564_vm1 = vweird.f32 %v4393_v1 }
 0x48b   : > { %3202 = vpow2.f32 %v2855_v6  ;;  %v2316_v7 = vadd.f32 %v2300_v60, %v2268_v13  ;;  %vm4454_vm2 = vmor %vm1563_vm0, %vm1564_vm1 }
 0x48c   : > { %3204 = vrcp.f32 %v4388_v51  ;;  %v1560_v38 = vsub.f32 1.0, %v1559_v0  ;;  %v1556_v55 = vsel %vm1553_vm15, %v1555_v36, %v1551_v56 }
 0x48d   : > { %2332 = vst [vmem:[%s3797_s10] sm:$0xff] %v2316_v7  ;;  %v2348_v57 = vpack.c.bf16 %v2316_v7, %v2316_v7  ;;  %3206 = vpow2.f32 %v2856_v21  ;;  %v1405_v21 = vadd.f32 %v4372_v29, %v4337_v26  ;;  %v2271_v52 = vmul.f32 %v4198_v24, %v1556_v55 }
 0x48e   : > { %v1561_v60 = vmul.f32 %v4393_v1, %v1560_v38  ;;  %v2287_v29 = vsub.f32 1.0, %v1556_v55  ;;  %v1584_v38 = vand.u32 2147483648, %v4388_v51 }
 0x48f   : > { %2364 = vst [vmem:[#allocation3] sm:$0xf] %v2348_v57  ;;  %v2201_v63 = vpop.f32.mrf.mxu2  ;;  %v2858_v57 = vmul.f32 -1.442695, %v1319_v9 }
 0x490   : > { %v3201_v59 = vpop.eup %3200  ;;  %v2238_v32 = vadd.f32 %v2201_v63, %v1400_v54  ;;  %v1562_v58 = vadd.f32 %v4393_v1, %v1561_v60 }
 0x491   : > { %v3203_v39 = vpop.eup %3202  ;;  %v2301_v53 = vmul.f32 %v3201_v59, %v2285_v40 }
 0x492   : > { %3208 = vtanh.f32 %v2238_v32  ;;  %v4419_v4 = vadd.f32 1.0, %v3203_v39  ;;  %v4427_v41 = vpop.eup %3204  ;;  %v1566_v11 = vsel %vm4454_vm2, %v4393_v1, %v1562_v58  ;;  %v1570_v32 = vor.u32 1.1754944e-38, %v1569_v61 }
 0x493   : > { %v2317_v42 = vadd.f32 %v2301_v53, %v2269_v45  ;;  %v3207_v6 = vpop.eup %3206  ;;  %v1574_v48 = vmul.f32 %v4427_v41, %v4388_v51  ;;  %v1567_v45 = vand.u32 2147483647, %v4361_v16  ;;  %vm1579_vm5 = vweird.f32 %v4427_v41 }
 0x494   : > { %3210 = vrcp.f32 %v4419_v4  ;;  %v4448_v27 = vadd.f32 1.0, %v3207_v6  ;;  %v1322_v53 = vadd.f32 %v4301_v33, %v4305_v28  ;;  %vm4482_vm6 = vmor %vm1578_vm4, %vm1579_vm5  ;;  %v1407_v33 = vadd.f32 %v4407_v37, %v4337_v26 }
 0x495   : > { %2333 = vst [vmem:[%s3797_s10 + $0x8] sm:$0xff] %v2317_v42  ;;  %v2349_v18 = vpack.c.bf16 %v2317_v42, %v2317_v42  ;;  %3212 = vpow2.f32 %v2857_v43  ;;  %v1575_v54 = vsub.f32 1.0, %v1574_v48  ;;  %vm1568_vm3 = vcmp.eq.f32.partialorder %v1567_v45, 8.507059e+37  ;;  %v4475_v42 = vpop.f32.mrf.mxu0 }
 0x496   : > { %v1571_v20 = vsel %vm1568_vm3, %v1570_v32, %v1566_v11  ;;  %v2859_v6 = vmul.f32 -1.442695, %v1322_v53  ;;  %v1324_v48 = vadd.f32 %v4307_v14, %v4305_v28  ;;  %vm1593_vm8 = vweird.f32 %v4419_v4 }
 0x497   : > { %2365 = vst [vmem:[#allocation3 + $0x8] sm:$0xf] %v2349_v18  ;;  %v2203_v46 = vpop.f32.mrf.mxu2  ;;  %v1576_v0 = vmul.f32 %v4427_v41, %v1575_v54  ;;  %v1597_v58 = vand.u32 2147483647, %v4419_v4  ;;  %v1327_v32 = vadd.f32 %v4311_v3, %v4305_v28  ;;  %vm1608_vm12 = vweird.f32 %v4448_v27 }
 0x498   : > { %v3209_v13 = vpop.eup %3208  ;;  %v2239_v49 = vadd.f32 %v2203_v46, %v1402_v34  ;;  %v2860_v14 = vmul.f32 -1.442695, %v1324_v48  ;;  %v1412_v3 = vadd.f32 %v4475_v42, %v4337_v26 }
 0x499   : > { %v2302_v15 = vmul.f32 %v3209_v13, %v2286_v12  ;;  %v1577_v17 = vadd.f32 %v4427_v41, %v1576_v0  ;;  %v2288_v12 = vsub.f32 1.0, %v1571_v20  ;;  %v1585_v13 = vor.u32 1.1754944e-38, %v1584_v38 }
 0x49a   : > { %3214 = vtanh.f32 %v2239_v49  ;;  %v4459_v40 = vpop.eup %3210  ;;  %vm1598_vm11 = vcmp.eq.f32.partialorder %v1597_v58, 8.507059e+37 }
 0x49b   : > { %v2318_v7 = vadd.f32 %v2302_v15, %v2270_v10  ;;  %v3213_v25 = vpop.eup %3212  ;;  %3216 = vrcp.f32 %v4448_v27  ;;  %v1589_v16 = vmul.f32 %v4459_v40, %v4419_v4  ;;  %v2272_v10 = vmul.f32 %v4218_v44, %v1571_v20 }
 0x49c   : > { %3218 = vpow2.f32 %v2858_v57  ;;  %v4471_v24 = vadd.f32 1.0, %v3213_v25  ;;  %v1581_v51 = vsel %vm4482_vm6, %v4427_v41, %v1577_v17  ;;  %vm1594_vm9 = vweird.f32 %v4459_v40 }
 0x49d   : > { %2334 = vst [vmem:[%s3797_s10 + $0x10] sm:$0xff] %v2318_v7  ;;  %v2350_v50 = vpack.c.bf16 %v2318_v7, %v2318_v7  ;;  %v1590_v47 = vsub.f32 1.0, %v1589_v16  ;;  %v1599_v41 = vand.u32 2147483648, %v4419_v4  ;;  %v1586_v61 = vsel %vm1583_vm7, %v1585_v13, %v1581_v51  ;;  %v1414_v57 = vpop.f32.mrf.mxu0  ;;  %vm4513_vm10 = vmor %vm1593_vm8, %vm1594_vm9 }
 0x49e   : > { %v1410_v7 = vadd.f32 %v4443_v19, %v4337_v26  ;;  %v2273_v19 = vmul.f32 %v4222_v31, %v1586_v61  ;;  %v2289_v8 = vsub.f32 1.0, %v1586_v61  ;;  %v1614_v31 = vand.u32 2147483648, %v4448_v27  ;;  %v3291_v61 = vld [vmem:[%s3778_s9 + $0x38] sm:$0xff] }
 0x49f   : > { %2366 = vst [vmem:[#allocation3 + $0x10] sm:$0xf] %v2350_v50  ;;  %v2206_v63 = vpop.f32.mrf.mxu2  ;;  %v1591_v37 = vmul.f32 %v4459_v40, %v1590_v47  ;;  %v1612_v17 = vand.u32 2147483647, %v4448_v27  ;;  %vm1623_vm0 = vweird.f32 %v4471_v24 }
 0x4a0   : > { %v3215_v59 = vpop.eup %3214  ;;  %v2240_v39 = vadd.f32 %v2206_v63, %v1405_v21  ;;  %v1600_v63 = vor.u32 1.1754944e-38, %v1599_v41  ;;  %v1627_v41 = vand.u32 2147483647, %v4471_v24 }
 0x4a1   : > { %v2303_v2 = vmul.f32 %v3215_v59, %v2287_v29  ;;  %v4479_v5 = vpop.eup %3216  ;;  %v1592_v21 = vadd.f32 %v4459_v40, %v1591_v37  ;;  %vm1613_vm15 = vcmp.eq.f32.partialorder %v1612_v17, 8.507059e+37  ;;  %v1415_v37 = vadd.f32 %v1414_v57, %v4337_v26 }
 0x4a2   : > { %3220 = vtanh.f32 %v2240_v39  ;;  %v3219_v34 = vpop.eup %3218  ;;  %v1604_v46 = vmul.f32 %v4479_v5, %v4448_v27  ;;  %vm1609_vm13 = vweird.f32 %v4479_v5  ;;  %vm1628_vm3 = vcmp.eq.f32.partialorder %v1627_v41, 8.507059e+37 }
 0x4a3   : > { %v2319_v1 = vadd.f32 %v2303_v2, %v2271_v52  ;;  %3222 = vrcp.f32 %v4471_v24  ;;  %v4500_v44 = vadd.f32 1.0, %v3219_v34  ;;  %v1596_v11 = vsel %vm4513_vm10, %v4459_v40, %v1592_v21  ;;  %vm4539_vm14 = vmor %vm1608_vm12, %vm1609_vm13 }
 0x4a4   : > { %v1605_v15 = vsub.f32 1.0, %v1604_v46  ;;  %v1601_v53 = vsel %vm1598_vm11, %v1600_v63, %v1596_v11  ;;  %v1629_v46 = vand.u32 2147483648, %v4471_v24 }
 0x4a5   : > { %2335 = vst [vmem:[%s3797_s10 + $0x18] sm:$0xff] %v2319_v1  ;;  %v2351_v43 = vpack.c.bf16 %v2319_v1, %v2319_v1  ;;  %v2274_v18 = vmul.f32 %v4242_v22, %v1601_v53  ;;  %v2290_v35 = vsub.f32 1.0, %v1601_v53  ;;  %vm1638_vm4 = vweird.f32 %v4500_v44 }
 0x4a6   : > { %v1606_v52 = vmul.f32 %v4479_v5, %v1605_v15  ;;  %v1630_v50 = vor.u32 1.1754944e-38, %v1629_v46 }
 0x4a7   : > { %2367 = vst [vmem:[#allocation3 + $0x18] sm:$0xf] %v2351_v43  ;;  %v2208_v56 = vpop.f32.mrf.mxu2  ;;  %v2861_v43 = vmul.f32 -1.442695, %v1327_v32  ;;  %v1642_v32 = vand.u32 2147483647, %v4500_v44 }
 0x4a8   : > { %v3221_v36 = vpop.eup %3220  ;;  %v2241_v60 = vadd.f32 %v2208_v56, %v1407_v33  ;;  %v1607_v20 = vadd.f32 %v4479_v5, %v1606_v52  ;;  %v1615_v33 = vor.u32 1.1754944e-38, %v1614_v31  ;;  %v1329_v56 = vadd.f32 %v4315_v30, %v4305_v28 }
 0x4a9   : > { %v2304_v49 = vmul.f32 %v3221_v36, %v2288_v12  ;;  %v4506_v54 = vpop.eup %3222  ;;  %v1644_v52 = vand.u32 2147483648, %v4500_v44  ;;  %vm1643_vm7 = vcmp.eq.f32.partialorder %v1642_v32, 8.507059e+37 }
 0x4aa   : > { %3224 = vtanh.f32 %v2241_v60  ;;  %v1619_v29 = vmul.f32 %v4506_v54, %v4471_v24  ;;  %v1611_v22 = vsel %vm4539_vm14, %v4479_v5, %v1607_v20  ;;  %vm1624_vm1 = vweird.f32 %v4506_v54 }
 0x4ab   : > { %3226 = vpow2.f32 %v2859_v6  ;;  %v2320_v9 = vadd.f32 %v2304_v49, %v2272_v10  ;;  %v1416_v6 = vpop.f32.mrf.mxu0  ;;  %v1616_v60 = vsel %vm1613_vm15, %v1615_v33, %v1611_v22  ;;  %v2862_v5 = vmul.f32 -1.442695, %v1329_v56  ;;  %vm4561_vm2 = vmor %vm1623_vm0, %vm1624_vm1 }
 0x4ac   : > { %3228 = vrcp.f32 %v4500_v44  ;;  %v1620_v16 = vsub.f32 1.0, %v1619_v29  ;;  %v1332_v29 = vadd.f32 %v4322_v23, %v4305_v28  ;;  %v1645_v20 = vor.u32 1.1754944e-38, %v1644_v52 }
 0x4ad   : > { %2336 = vst [vmem:[%s3797_s10 + $0x20] sm:$0xff] %v2320_v9  ;;  %v2352_v55 = vpack.c.bf16 %v2320_v9, %v2320_v9  ;;  %3230 = vpow2.f32 %v2860_v14  ;;  %v2291_v14 = vsub.f32 1.0, %v1616_v60 }
 0x4ae   : > { %v1621_v12 = vmul.f32 %v4506_v54, %v1620_v16  ;;  %v2863_v53 = vmul.f32 -1.442695, %v1332_v29 }
 0x4af   : > { %2368 = vst [vmem:[#allocation3 + $0x20] sm:$0xf] %v2352_v55  ;;  %v2211_v45 = vpop.f32.mrf.mxu2 }
 0x4b0   : > { %v3225_v25 = vpop.eup %3224  ;;  %v2242_v59 = vadd.f32 %v2211_v45, %v1410_v7  ;;  %v1622_v48 = vadd.f32 %v4506_v54, %v1621_v12  ;;  %v2275_v7 = vmul.f32 %v3291_v61, %v1616_v60 }
 0x4b1   : > { %v3227_v4 = vpop.eup %3226  ;;  %v2305_v0 = vmul.f32 %v3225_v25, %v2289_v8 }
 0x4b2   : > { %3232 = vtanh.f32 %v2242_v59  ;;  %v4530_v2 = vadd.f32 1.0, %v3227_v4  ;;  %v4532_v1 = vpop.eup %3228  ;;  %v1626_v57 = vsel %vm4561_vm2, %v4506_v54, %v1622_v48 }
 0x4b3   : > { %v2321_v39 = vadd.f32 %v2305_v0, %v2273_v19  ;;  %v3231_v47 = vpop.eup %3230  ;;  %v1634_v27 = vmul.f32 %v4532_v1, %v4500_v44  ;;  %v1419_v25 = vpop.f32.mrf.mxu0  ;;  %vm1639_vm5 = vweird.f32 %v4532_v1  ;;  %v1631_v59 = vsel %vm1628_vm3, %v1630_v50, %v1626_v57 }
 0x4b4   : > { %3234 = vrcp.f32 %v4530_v2  ;;  %v4556_v51 = vadd.f32 1.0, %v3231_v47  ;;  %vm4591_vm6 = vmor %vm1638_vm4, %vm1639_vm5  ;;  %v3292_v47 = vld [vmem:[%s3778_s9 + $0x40] sm:$0xff]  ;;  %vm1653_vm8 = vweird.f32 %v4530_v2  ;;  %v1657_v46 = vand.u32 2147483647, %v4530_v2 }
 0x4b5   : > { %2337 = vst [vmem:[%s3797_s10 + $0x28] sm:$0xff] %v2321_v39  ;;  %v2353_v40 = vpack.c.bf16 %v2321_v39, %v2321_v39  ;;  %v1635_v30 = vsub.f32 1.0, %v1634_v27  ;;  %v1417_v39 = vadd.f32 %v1416_v6, %v4337_v26  ;;  %v1334_v6 = vadd.f32 %v4334_v62, %v4305_v28 }
 0x4b6   : > { %v1659_v27 = vand.u32 2147483648, %v4530_v2  ;;  %vm1658_vm11 = vcmp.eq.f32.partialorder %v1657_v46, 8.507059e+37  ;;  %vm1668_vm12 = vweird.f32 %v4556_v51 }
 0x4b7   : > { %2369 = vst [vmem:[#allocation3 + $0x28] sm:$0xf] %v2353_v40  ;;  %v2213_v34 = vpop.f32.mrf.mxu2  ;;  %v1636_v58 = vmul.f32 %v4532_v1, %v1635_v30  ;;  %v2292_v40 = vsub.f32 1.0, %v1631_v59  ;;  %v2864_v62 = vmul.f32 -1.442695, %v1334_v6 }
 0x4b8   : > { %v3233_v10 = vpop.eup %3232  ;;  %v2243_v42 = vadd.f32 %v2213_v34, %v1412_v3  ;;  %v1660_v9 = vor.u32 1.1754944e-38, %v1659_v27 }
 0x4b9   : > { %v2306_v36 = vmul.f32 %v3233_v10, %v2290_v35  ;;  %v1637_v31 = vadd.f32 %v4532_v1, %v1636_v58 }
 0x4ba   : > { %3236 = vtanh.f32 %v2243_v42  ;;  %v4566_v15 = vpop.eup %3234 }
 0x4bb   : > { %3238 = vpow2.f32 %v2861_v43  ;;  %v2322_v13 = vadd.f32 %v2306_v36, %v2274_v18  ;;  %v1649_v24 = vmul.f32 %v4566_v15, %v4530_v2  ;;  %v2276_v43 = vmul.f32 %v3292_v47, %v1631_v59  ;;  %v1421_v12 = vpop.f32.mrf.mxu0 }
 0x4bc   : > { %3240 = vrcp.f32 %v4556_v51  ;;  %v1641_v33 = vsel %vm4591_vm6, %v4532_v1, %v1637_v31  ;;  %vm1654_vm9 = vweird.f32 %v4566_v15  ;;  %v1420_v1 = vadd.f32 %v1419_v25, %v4337_v26  ;;  %v3294_v31 = vld [vmem:[%s3778_s9 + $0x50] sm:$0xff] }
 0x4bd   : > { %2338 = vst [vmem:[%s3797_s10 + $0x30] sm:$0xff] %v2322_v13  ;;  %v2354_v49 = vpack.c.bf16 %v2322_v13, %v2322_v13  ;;  %3242 = vpow2.f32 %v2862_v5  ;;  %v1650_v0 = vsub.f32 1.0, %v1649_v24  ;;  %v1646_v56 = vsel %vm1643_vm7, %v1645_v20, %v1641_v33  ;;  %vm4620_vm10 = vmor %vm1653_vm8, %vm1654_vm9  ;;  %v3293_v5 = vld [vmem:[%s3778_s9 + $0x48] sm:$0xff]  ;;  %v3295_v33 = vld [vmem:[%s3778_s9 + $0x58] sm:$0xff] }
 0x4be   : > { %v2293_v30 = vsub.f32 1.0, %v1646_v56  ;;  %v1672_v24 = vand.u32 2147483647, %v4556_v51  ;;  %v1422_v25 = vadd.f32 %v1421_v12, %v4337_v26 }
 0x4bf   : > { %2370 = vst [vmem:[#allocation3 + $0x30] sm:$0xf] %v2354_v49  ;;  %v2216_v55 = vpop.f32.mrf.mxu2  ;;  %v1651_v44 = vmul.f32 %v4566_v15, %v1650_v0  ;;  %v2277_v49 = vmul.f32 %v3293_v5, %v1646_v56 }
 0x4c0   : > { %v3237_v21 = vpop.eup %3236  ;;  %v2244_v19 = vadd.f32 %v2216_v55, %v1415_v37  ;;  %v1674_v55 = vand.u32 2147483648, %v4556_v51  ;;  %vm1673_vm15 = vcmp.eq.f32.partialorder %v1672_v24, 8.507059e+37 }
 0x4c1   : > { %v3239_v8 = vpop.eup %3238  ;;  %v2307_v45 = vmul.f32 %v3237_v21, %v2291_v14  ;;  %v1652_v22 = vadd.f32 %v4566_v15, %v1651_v44 }
 0x4c2   : > { %3244 = vtanh.f32 %v2244_v19  ;;  %v4581_v63 = vadd.f32 1.0, %v3239_v8  ;;  %v4583_v4 = vpop.eup %3240 }
 0x4c3   : > { %v2323_v54 = vadd.f32 %v2307_v45, %v2275_v7  ;;  %v3243_v16 = vpop.eup %3242  ;;  %v1664_v38 = vmul.f32 %v4583_v4, %v4556_v51  ;;  %v1656_v14 = vsel %vm4620_vm10, %v4566_v15, %v1652_v22  ;;  %vm1669_vm13 = vweird.f32 %v4583_v4  ;;  %v1424_v45 = vpop.f32.mrf.mxu0 }
 0x4c4   : > { %3246 = vrcp.f32 %v4581_v63  ;;  %v4605_v34 = vadd.f32 1.0, %v3243_v16  ;;  %v1661_v57 = vsel %vm1658_vm11, %v1660_v9, %v1656_v14  ;;  %vm4645_vm14 = vmor %vm1668_vm12, %vm1669_vm13  ;;  %vm1683_vm0 = vweird.f32 %v4581_v63 }
 0x4c5   : > { %2339 = vst [vmem:[%s3797_s10 + $0x38] sm:$0xff] %v2323_v54  ;;  %v2355_v11 = vpack.c.bf16 %v2323_v54, %v2323_v54  ;;  %v1665_v42 = vsub.f32 1.0, %v1664_v38  ;;  %v2294_v29 = vsub.f32 1.0, %v1661_v57  ;;  %v1675_v54 = vor.u32 1.1754944e-38, %v1674_v55 }
 0x4c6   : > { %v2278_v32 = vmul.f32 %v3294_v31, %v1661_v57  ;;  %v1425_v47 = vadd.f32 %v1424_v45, %v4337_v26  ;;  %vm1698_vm4 = vweird.f32 %v4605_v34 }
 0x4c7   : > { %2371 = vst [vmem:[#allocation3 + $0x38] sm:$0xf] %v2355_v11  ;;  %v2218_v17 = vpop.f32.mrf.mxu2  ;;  %v1666_v48 = vmul.f32 %v4583_v4, %v1665_v42 }
 0x4c8   : > { %v3245_v3 = vpop.eup %3244  ;;  %v2245_v18 = vadd.f32 %v2218_v17, %v1417_v39 }
 0x4c9   : > { %v2308_v35 = vmul.f32 %v3245_v3, %v2292_v40  ;;  %v1667_v15 = vadd.f32 %v4583_v4, %v1666_v48  ;;  %v1689_v40 = vand.u32 2147483648, %v4581_v63 }
 0x4ca   : > { %3248 = vtanh.f32 %v2245_v18  ;;  %v4614_v13 = vpop.eup %3246  ;;  %v1687_v18 = vand.u32 2147483647, %v4581_v63 }
 0x4cb   : > { %3250 = vpow2.f32 %v2863_v53  ;;  %v2324_v10 = vadd.f32 %v2308_v35, %v2276_v43  ;;  %v1679_v2 = vmul.f32 %v4614_v13, %v4581_v63  ;;  %v1671_v53 = vsel %vm4645_vm14, %v4583_v4, %v1667_v15  ;;  %v1426_v27 = vpop.f32.mrf.mxu0 }
 0x4cc   : > { %3252 = vrcp.f32 %v4605_v34  ;;  %vm1684_vm1 = vweird.f32 %v4614_v13  ;;  %v1676_v38 = vsel %vm1673_vm15, %v1675_v54, %v1671_v53  ;;  %vm1688_vm3 = vcmp.eq.f32.partialorder %v1687_v18, 8.507059e+37 }
 0x4cd   : > { %2340 = vst [vmem:[%s3797_s10 + $0x40] sm:$0xff] %v2324_v10  ;;  %v2356_v36 = vpack.c.bf16 %v2324_v10, %v2324_v10  ;;  %v1680_v19 = vsub.f32 1.0, %v1679_v2  ;;  %vm4668_vm2 = vmor %vm1683_vm0, %vm1684_vm1  ;;  %v2279_v6 = vmul.f32 %v3295_v33, %v1676_v38  ;;  %v2295_v10 = vsub.f32 1.0, %v1676_v38 }
 0x4ce   : > { %v1427_v9 = vadd.f32 %v1426_v27, %v4337_v26 }
 0x4cf   : > { %2372 = vst [vmem:[#allocation3 + $0x40] sm:$0xf] %v2356_v36  ;;  %v2221_v60 = vpop.f32.mrf.mxu2  ;;  %v1681_v51 = vmul.f32 %v4614_v13, %v1680_v19 }
 0x4d0   : > { %v3249_v37 = vpop.eup %3248  ;;  %v2246_v41 = vadd.f32 %v2221_v60, %v1420_v1  ;;  %v1690_v1 = vor.u32 1.1754944e-38, %v1689_v40 }
 0x4d1   : > { %v3251_v61 = vpop.eup %3250  ;;  %v2309_v7 = vmul.f32 %v3249_v37, %v2293_v30  ;;  %v1682_v4 = vadd.f32 %v4614_v13, %v1681_v51 }
 0x4d2   : > { %3254 = vtanh.f32 %v2246_v41  ;;  %v4635_v58 = vadd.f32 1.0, %v3251_v61  ;;  %v4637_v50 = vpop.eup %3252 }
 0x4d3   : > { %3256 = vpow2.f32 %v2864_v62  ;;  %v2325_v21 = vadd.f32 %v2309_v7, %v2277_v49  ;;  %v1694_v11 = vmul.f32 %v4637_v50, %v4605_v34  ;;  %v1686_v46 = vsel %vm4668_vm2, %v4614_v13, %v1682_v4  ;;  %v3296_v7 = vld [vmem:[%s3778_s9 + $0x60] sm:$0xff]  ;;  %v1429_v15 = vpop.f32.mrf.mxu0 }
 0x4d4   : > { %3258 = vrcp.f32 %v4635_v58  ;;  %vm1699_vm5 = vweird.f32 %v4637_v50  ;;  %v1704_v62 = vand.u32 2147483648, %v4605_v34  ;;  %v1691_v30 = vsel %vm1688_vm3, %v1690_v1, %v1686_v46 }
 0x4d5   : > { %2341 = vst [vmem:[%s3797_s10 + $0x48] sm:$0xff] %v2325_v21  ;;  %v2357_v8 = vpack.c.bf16 %v2325_v21, %v2325_v21  ;;  %v1695_v17 = vsub.f32 1.0, %v1694_v11  ;;  %vm4685_vm6 = vmor %vm1698_vm4, %vm1699_vm5  ;;  %v1702_v13 = vand.u32 2147483647, %v4605_v34  ;;  %v2296_v41 = vsub.f32 1.0, %v1691_v30 }
 0x4d6   : > { %v2280_v14 = vmul.f32 %v3296_v7, %v1691_v30  ;;  %v1705_v21 = vor.u32 1.1754944e-38, %v1704_v62  ;;  %vm1713_vm8 = vweird.f32 %v4635_v58 }
 0x4d7   : > { %2373 = vst [vmem:[#allocation3 + $0x48] sm:$0xf] %v2357_v8  ;;  %v2223_v59 = vpop.f32.mrf.mxu2  ;;  %v1696_v56 = vmul.f32 %v4637_v50, %v1695_v17  ;;  %vm1703_vm7 = vcmp.eq.f32.partialorder %v1702_v13, 8.507059e+37 }
 0x4d8   : > { %v3255_v0 = vpop.eup %3254  ;;  %v2247_v39 = vadd.f32 %v2223_v59, %v1422_v25  ;;  %v1430_v25 = vadd.f32 %v1429_v15, %v4337_v26  ;;  %v1717_v59 = vand.u32 2147483647, %v4635_v58 }
 0x4d9   : > { %v3257_v23 = vpop.eup %3256  ;;  %v2310_v16 = vmul.f32 %v3255_v0, %v2294_v29  ;;  %v1697_v60 = vadd.f32 %v4637_v50, %v1696_v56 }
 0x4da   : > { %3260 = vtanh.f32 %v2247_v39  ;;  %v4660_v3 = vadd.f32 1.0, %v3257_v23  ;;  %v4666_v44 = vpop.eup %3258  ;;  %v3297_v39 = vld [vmem:[%s3778_s9 + $0x68] sm:$0xff]  ;;  %vm1718_vm11 = vcmp.eq.f32.partialorder %v1717_v59, 8.507059e+37 }
 0x4db   : > { %v2326_v20 = vadd.f32 %v2310_v16, %v2278_v32  ;;  %v1709_v36 = vmul.f32 %v4666_v44, %v4635_v58  ;;  %v1701_v55 = vsel %vm4685_vm6, %v4637_v50, %v1697_v60  ;;  %vm1714_vm9 = vweird.f32 %v4666_v44  ;;  %v1431_v17 = vpop.f32.mrf.mxu0 }
 0x4dc   : > { %3262 = vrcp.f32 %v4660_v3  ;;  %v1719_v50 = vand.u32 2147483648, %v4635_v58  ;;  %v1706_v45 = vsel %vm1703_vm7, %v1705_v21, %v1701_v55  ;;  %vm4707_vm10 = vmor %vm1713_vm8, %vm1714_vm9  ;;  %vm1728_vm12 = vweird.f32 %v4660_v3 }
 0x4dd   : > { %2342 = vst [vmem:[%s3797_s10 + $0x50] sm:$0xff] %v2326_v20  ;;  %v2358_v43 = vpack.c.bf16 %v2326_v20, %v2326_v20  ;;  %v1710_v37 = vsub.f32 1.0, %v1709_v36  ;;  %v2297_v11 = vsub.f32 1.0, %v1706_v45  ;;  %v2281_v23 = vmul.f32 %v3297_v39, %v1706_v45 }
 0x4de   : > { %v1720_v51 = vor.u32 1.1754944e-38, %v1719_v50  ;;  %v1734_v38 = vand.u32 2147483648, %v4660_v3  ;;  %v1732_v18 = vand.u32 2147483647, %v4660_v3 }
 0x4df   : > { %2374 = vst [vmem:[#allocation3 + $0x50] sm:$0xf] %v2358_v43  ;;  %v2226_v12 = vpop.f32.mrf.mxu2  ;;  %v1711_v19 = vmul.f32 %v4666_v44, %v1710_v37 }
 0x4e0   : > { %v3261_v42 = vpop.eup %3260  ;;  %v2248_v63 = vadd.f32 %v2226_v12, %v1425_v47  ;;  %v1735_v12 = vor.u32 1.1754944e-38, %v1734_v38  ;;  %vm1733_vm15 = vcmp.eq.f32.partialorder %v1732_v18, 8.507059e+37 }
 0x4e1   : > { %v2311_v22 = vmul.f32 %v3261_v42, %v2295_v10  ;;  %v1712_v54 = vadd.f32 %v4666_v44, %v1711_v19  ;;  %v3298_v42 = vld [vmem:[%s3778_s9 + $0x70] sm:$0xff] }
 0x4e2   : > { %3264 = vtanh.f32 %v2248_v63  ;;  %v4690_v49 = vpop.eup %3262 }
 0x4e3   : > { %v2327_v28 = vadd.f32 %v2311_v22, %v2279_v6  ;;  %v1724_v34 = vmul.f32 %v4690_v49, %v4660_v3  ;;  %v1716_v58 = vsel %vm4707_vm10, %v4666_v44, %v1712_v54  ;;  %vm1729_vm13 = vweird.f32 %v4690_v49 }
 0x4e4   : > { %v1721_v47 = vsel %vm1718_vm11, %v1720_v51, %v1716_v58  ;;  %v1432_v44 = vadd.f32 %v1431_v17, %v4337_v26  ;;  %vm4723_vm14 = vmor %vm1728_vm12, %vm1729_vm13 }
 0x4e5   : > { %2343 = vst [vmem:[%s3797_s10 + $0x58] sm:$0xff] %v2327_v28  ;;  %v2359_v48 = vpack.c.bf16 %v2327_v28, %v2327_v28  ;;  %v1725_v52 = vsub.f32 1.0, %v1724_v34  ;;  %v2298_v33 = vsub.f32 1.0, %v1721_v47  ;;  %v2282_v56 = vmul.f32 %v3298_v42, %v1721_v47  ;;  %v3299_v28 = vld [vmem:[%s3778_s9 + $0x78] sm:$0xff] }
 0x4e7   : > { %2375 = vst [vmem:[#allocation3 + $0x58] sm:$0xf] %v2359_v48  ;;  %v2228_v61 = vpop.f32.mrf.mxu2  ;;  %v1726_v53 = vmul.f32 %v4690_v49, %v1725_v52 }
 0x4e8   : > { %v3265_v2 = vpop.eup %3264  ;;  %v2249_v57 = vadd.f32 %v2228_v61, %v1427_v9 }
 0x4e9   : > { %v2312_v8 = vmul.f32 %v3265_v2, %v2296_v41  ;;  %v1727_v4 = vadd.f32 %v4690_v49, %v1726_v53 }
 0x4ea   : > { %3266 = vtanh.f32 %v2249_v57 }
 0x4eb   : > { %v2328_v24 = vadd.f32 %v2312_v8, %v2280_v14  ;;  %v1731_v26 = vsel %vm4723_vm14, %v4690_v49, %v1727_v4 }
 0x4ec   : > { %v1736_v63 = vsel %vm1733_vm15, %v1735_v12, %v1731_v26 }
 0x4ed   : > { %2344 = vst [vmem:[%s3797_s10 + $0x60] sm:$0xff] %v2328_v24  ;;  %v2360_v29 = vpack.c.bf16 %v2328_v24, %v2328_v24  ;;  %v2299_v22 = vsub.f32 1.0, %v1736_v63  ;;  %v2283_v62 = vmul.f32 %v3299_v28, %v1736_v63 }
 0x4ef   : > { %2376 = vst [vmem:[#allocation3 + $0x60] sm:$0xf] %v2360_v29  ;;  %v2231_v31 = vpop.f32.mrf.mxu2 }
 0x4f0   : > { %v3267_v32 = vpop.eup %3266  ;;  %v2250_v16 = vadd.f32 %v2231_v31, %v1430_v25 }
 0x4f1   : > { %v2313_v40 = vmul.f32 %v3267_v32, %v2297_v11 }
 0x4f2   : > { %3268 = vtanh.f32 %v2250_v16 }
 0x4f3   : > { %v2329_v20 = vadd.f32 %v2313_v40, %v2281_v23 }
 0x4f5   : > { %2345 = vst [vmem:[%s3797_s10 + $0x68] sm:$0xff] %v2329_v20  ;;  %v2361_v43 = vpack.c.bf16 %v2329_v20, %v2329_v20 }
 0x4f7   : > { %2377 = vst [vmem:[#allocation3 + $0x68] sm:$0xf] %v2361_v43  ;;  %v2233_v6 = vpop.f32.mrf.mxu2 }
 0x4f8   : > { %v3269_v10 = vpop.eup %3268  ;;  %v2251_v27 = vadd.f32 %v2233_v6, %v1432_v44 }
 0x4f9   : > { %v2314_v1 = vmul.f32 %v3269_v10, %v2298_v33 }
 0x4fa   : > { %3270 = vtanh.f32 %v2251_v27 }
 0x4fb   : > { %v2330_v3 = vadd.f32 %v2314_v1, %v2282_v56 }
 0x4fd   : > { %2346 = vst [vmem:[%s3797_s10 + $0x70] sm:$0xff] %v2330_v3  ;;  %v2362_v36 = vpack.c.bf16 %v2330_v3, %v2330_v3 }
 0x4ff   : > { %2378 = vst [vmem:[#allocation3 + $0x70] sm:$0xf] %v2362_v36 }
 0x500   : > { %v3271_v46 = vpop.eup %3270 }
 0x501   : > { %v2315_v30 = vmul.f32 %v3271_v46, %v2299_v22 }
 0x503   : > { %v2331_v60 = vadd.f32 %v2315_v30, %v2283_v62 }
 0x505   : > { %2347 = vst [vmem:[%s3797_s10 + $0x78] sm:$0xff] %v2331_v60  ;;  %v2363_v37 = vpack.c.bf16 %v2331_v60, %v2331_v60 }
 0x506   : > { %3501 = shalt.err (!%p3498_p2)
}
 0x507   : > { %s3560_s11 = smov 128   ;;  %s3561_s10 = smov 8   ;;  %2379 = vst [vmem:[#allocation3 + $0x78] sm:$0xf] %v2363_v37 }
 0x508   : > { %3043 = dma.vmem_to_hbm [thread:$0]  (%p3709_p7), %s2394_s15, 2048, %s2396_s27, %s2381_s2, %s3560_s11, %s3560_s11, %s3561_s10  }
 0x509 PF: > { %s2410_s26 = sand.u32 1, %s3538_s21   ;;  %p4838_p4 = scmp.ge.s32.totalorder %s3550_s24, 2 }
 0x50a   : > { %s2411_s28 = scalar_lea.sflag [#allocation6], %s2410_s26 }
 0x50b   : > { %p3063_p10 = pnand %p4838_p4, %p3713_p9 }
 0x50d   : > { %p3064_p0 = pneg %p3063_p10 }
 0x50f   : > { %3533 = dma.done.wait (%p3064_p0), %s2411_s28, 2048  }
 0x510   : > { %3535 = vsyncadd (%p3064_p0), %s2411_s28, 4294965248  ;;  %s4839_s30 = sld [smem:[#allocation24_spill]]  ;;  %p23_p12 = scmp.ge.s32.totalorder %s3618_s25, 4  }
 0x511   : > { %s4840_s23 = sld [smem:[#allocation25_spill]]  ;;  %s4841_s21 = smov %s3542_s22 }
 0x512   : > { %s4843_s24 = smov %s3618_s25  ;;  %25 = sbr.rel (!%p23_p12) target bundleno = 12 (0xc), region = 134 }
 0x516   : > { %s4842_s22 = smov %s4839_s30 }
 0x517   :  { %2417 = vsyncpa [#allocation5], 1 }
 0x518   :  { %2419 = vsyncpa [#allocation5 + $0x1], 1 }
 0x519   :  { %2420 = vsyncpa [#allocation8], 1 }
 0x51a   :  { %2422 = vsyncpa [#allocation8 + $0x1], 1 }
 0x51b   :  { %2423 = vsyncpa [#allocation11], 1 }
 0x51c   :  { %2425 = vsyncpa [#allocation11 + $0x1], 1 }
 0x51d   :  { %2426 = vsyncpa [#allocation6], 1 }
 0x51e   :  { %2428 = vsyncpa [#allocation6 + $0x1], 1 }

</bundles_post_ra>
